<compile_context>
chip_gen: v5e
topology: v5e:2x2
jax: 0.10.0
libtpu: 0.0.40
codegen_flags: <defaults>
</compile_context>

<pallas_src>
import math

import jax
import jax.numpy as jnp
from jax.experimental import pallas as pl
from jax.experimental.pallas import tpu as pltpu


def _default_compute_dtype():
    """bf16 matmul inputs (f32 accumulation) on bf16-native chips (v6e/v7x);
    f32 on v5e and older, where bf16 pack/unpack casts are pure overhead."""
    try:
        kind = jax.devices()[0].device_kind.lower()
    except Exception:
        return jnp.float32
    if "v6" in kind or "v7" in kind:
        return jnp.bfloat16
    return jnp.float32


def _make_kernel(bt, S, D, H, cdt):
    N = H * S  # flattened (head, key) lane dimension
    rows = bt * S

    def kernel(x_ref, wqkv_ref, bqkv_ref, wo_ref, bo_ref,
               bias_ref, mask_ref, blk_ref, o_ref):
        # ---- Fused QKV projection: one (rows, D) @ (D, 3D) MXU matmul. ----
        # 1/sqrt(head_dim) is already folded into the Q columns of wqkv/bqkv.
        x = x_ref[...]                                                # (rows, D) cdt
        qkv = jnp.dot(x, wqkv_ref[...], preferred_element_type=jnp.float32)
        qkv = (qkv + bqkv_ref[...]).astype(cdt)                       # (rows, 3D)

        q = qkv[:, :D].reshape(bt, S, D)                              # (bt, S, D)
        k = qkv[:, D:2 * D].reshape(bt, S, D)
        v = qkv[:, 2 * D:].reshape(bt, S, D)

        # ---- Head-batched attention (no per-head loop / lane slices). ----
        # Replicate K/V H times along the key axis and zero cross-head columns
        # with a precomputed block-diagonal mask, so the contraction over the
        # full D only picks up head h's dims for score column n = h*S + key.
        mask = mask_ref[...]                                          # (N, D) 0/1 cdt
        k3 = jnp.concatenate([k] * H, axis=1) * mask[None]            # (bt, N, D)
        v3 = jnp.concatenate([v] * H, axis=1) * mask[None]            # (bt, N, D)

        s = jnp.einsum("bqd,bnd->bqn", q, k3,
                       preferred_element_type=jnp.float32)            # (bt, S, N)
        s = s + bias_ref[...][None]                                   # property bias, one add

        # Per-head softmax over keys, kept lane-dense:
        #  * a per-(b,q) max over all heads is constant along each head's key
        #    segment, hence a valid stability shift for every head's softmax;
        #  * blk[n, n'] = (n//S == n'//S) sums each head's segment and
        #    broadcasts the denominator back across it in one small matmul.
        m = jnp.max(s, axis=-1, keepdims=True)
        p = jnp.exp(s - m).reshape(rows, N)                           # (rows, N) f32
        denom = jnp.dot(p, blk_ref[...], preferred_element_type=jnp.float32)
        attn = (p * pl.reciprocal(denom, approx=True)).astype(cdt)
        # TODO(synk): Dropout on attention weights is identity in eval mode; not applied.

        # PV with the block-diagonal V replica: output columns land directly in
        # concatenated-head order, feeding ONE (rows, D) @ (D, D) projection.
        o = jnp.einsum("bqn,bnd->bqd", attn.reshape(bt, S, N), v3,
                       preferred_element_type=jnp.float32)            # (bt, S, D)
        out = jnp.dot(o.reshape(rows, D).astype(cdt), wo_ref[...],
                      preferred_element_type=jnp.float32) + bo_ref[...]
        # TODO(synk): benchmark-gated option: relayout to (rows//4, 4*D) here for a
        # fully 128-lane-dense store (one extra relayout with the single-step grid).
        o_ref[...] = out.astype(o_ref.dtype)

    return kernel


def _pick_batch_tile(batch, seq, d_model, num_heads, budget_bytes=8 << 20):
    """Batch-tile size bt.  Prefers a single grid step (bt = batch): v5e/v6e
    have one TensorCore, so extra steps only add fixed per-step overhead, and a
    bigger M keeps the MXU fed.  Splits only when the per-step f32 working set
    would exceed `budget_bytes` (kept <= 8 MiB so a tile that fits v5e/v6e also
    fits v7x's smaller 64 MiB VMEM)."""
    def step_bytes(bt):
        rows = bt * seq
        n = num_heads * seq
        return 4 * (4 * rows * d_model        # x + out blocks (double-buffered)
                    + 3 * rows * d_model      # fused qkv
                    + 2 * bt * n * d_model    # replicated + masked K, V
                    + 2 * bt * seq * n        # scores + attention weights
                    + rows * d_model)         # pre-projection head outputs

    if step_bytes(batch) <= budget_bytes:
        return batch                          # single grid step
    best = 1
    for bt in range(1, batch + 1):
        if batch % bt:
            continue
        # Split blocks must keep the sublane dim (bt*seq) 8-aligned; a full
        # block (bt == batch) is exempt from the (8, 128) divisibility rule.
        if bt != batch and (bt * seq) % 8:
            continue
        if step_bytes(bt) <= budget_bytes:
            best = bt
    return best


def property_focused_attention(x, params, num_heads, property_bias, *,
                               compute_dtype=None):
    """x: (B, S, D).  params: dict of (in, out) weights and (out,) biases."""
    B, S, D = x.shape
    H = num_heads
    hd = D // H
    out_dtype = x.dtype
    cdt = compute_dtype if compute_dtype is not None else _default_compute_dtype()

    # Effective (H, S, S) property bias (mirrors the PyTorch pad/crop branches).
    if property_bias is not None:
        _, P, _ = property_bias.shape
        if P == S:
            bias_full = property_bias
        elif S <= P:
            bias_full = property_bias[:, :S, :S]
        else:
            bias_full = jnp.zeros((H, S, S), jnp.float32).at[:, :P, :P].set(property_bias)
    else:
        bias_full = jnp.zeros((H, S, S), jnp.float32)
    # Lane-dense flat layout used in-kernel: bias_flat[q, h*S + k] = bias[h, q, k].
    bias_flat = bias_full.astype(jnp.float32).transpose(1, 0, 2).reshape(S, H * S)

    # Fused QKV weight/bias with 1/sqrt(head_dim) folded into the Q columns.
    scale = 1.0 / math.sqrt(hd)
    wqkv = jnp.concatenate([params["wq"] * scale, params["wk"], params["wv"]],
                           axis=1).astype(cdt)                          # (D, 3D)
    bqkv = jnp.concatenate([params["bq"] * scale, params["bk"], params["bv"]]
                           ).reshape(1, 3 * D).astype(jnp.float32)      # (1, 3D)
    wo = params["wo"].astype(cdt)                                       # (D, D)
    bo = params["bo"].reshape(1, D).astype(jnp.float32)                 # (1, D)

    # Block-diagonal helpers (trace-time constants).
    head_of_col = jnp.arange(D) // hd                                   # (D,)
    head_of_key = jnp.arange(H * S) // S                                # (H*S,)
    mask_kd = (head_of_key[:, None] == head_of_col[None, :]).astype(cdt)       # (H*S, D)
    blk = (head_of_key[:, None] == head_of_key[None, :]).astype(jnp.float32)   # (H*S, H*S)

    bt = _pick_batch_tile(B, S, D, H)
    grid = (B // bt,)
    rows = bt * S
    x2d = x.reshape(B * S, D).astype(cdt)

    kernel = _make_kernel(bt, S, D, H, cdt)
    const = lambda i: (0, 0)

    out2d = pl.pallas_call(
        kernel,
        out_shape=jax.ShapeDtypeStruct((B * S, D), out_dtype),
        grid_spec=pltpu.PrefetchScalarGridSpec(
            num_scalar_prefetch=0,
            grid=grid,
            in_specs=[
                pl.BlockSpec((rows, D), lambda i: (i, 0)),      # x tile
                pl.BlockSpec((D, 3 * D), const),                # fused W_qkv (scaled Q)
                pl.BlockSpec((1, 3 * D), const),                # fused b_qkv
                pl.BlockSpec((D, D), const),                    # W_out
                pl.BlockSpec((1, D), const),                    # b_out
                pl.BlockSpec((S, H * S), const),                # property bias (flat)
                pl.BlockSpec((H * S, D), const),                # block-diag head mask
                pl.BlockSpec((H * S, H * S), const),            # segment-sum matrix
            ],
            out_specs=pl.BlockSpec((rows, D), lambda i: (i, 0)),
        ),
        compiler_params=pltpu.CompilerParams(
            dimension_semantics=("parallel",),
            vmem_limit_bytes=32 * 1024 * 1024,   # <= v7x physical VMEM headroom
        ),
    )(x2d, wqkv, bqkv, wo, bo, bias_flat, mask_kd, blk)
    return out2d.reshape(B, S, D)


def reference_attention(x, params, num_heads, property_bias):
    """Pure-JAX reference mirroring the PyTorch forward (dropout in eval)."""
    B, S, D = x.shape
    hd = D // num_heads
    q = x @ params["wq"] + params["bq"]
    k = x @ params["wk"] + params["bk"]
    v = x @ params["wv"] + params["bv"]
    q = q.reshape(B, S, num_heads, hd).transpose(0, 2, 1, 3)
    k = k.reshape(B, S, num_heads, hd).transpose(0, 2, 1, 3)
    v = v.reshape(B, S, num_heads, hd).transpose(0, 2, 1, 3)
    scores = jnp.einsum("bhsd,bhtd->bhst", q, k) / math.sqrt(hd)
    if property_bias is not None:
        H, P, _ = property_bias.shape
        if P == S:
            bias = property_bias
        elif S <= P:
            bias = property_bias[:, :S, :S]
        else:
            bias = jnp.zeros((H, S, S), x.dtype).at[:, :P, :P].set(property_bias)
        scores = scores + bias[None]
    attn = jax.nn.softmax(scores, axis=-1)
    out = jnp.einsum("bhst,bhtd->bhsd", attn, v)
    out = out.transpose(0, 2, 1, 3).reshape(B, S, D)
    return out @ params["wo"] + params["bo"]


def init_params(key, d_model):
    """Deterministic synthetic parameters (PyTorch Linear-like scales)."""
    keys = jax.random.split(key, 8)
    scale = 1.0 / math.sqrt(d_model)

    def mat(k):
        return jax.random.uniform(k, (d_model, d_model), jnp.float32, -scale, scale)

    def vec(k):
        return jax.random.uniform(k, (d_model,), jnp.float32, -scale, scale)

    return {
        "wq": mat(keys[0]), "bq": vec(keys[1]),
        "wk": mat(keys[2]), "bk": vec(keys[3]),
        "wv": mat(keys[4]), "bv": vec(keys[5]),
        "wo": mat(keys[6]), "bo": vec(keys[7]),
    }


if __name__ == "__main__":
    # d_model=32, num_heads=4, seq_len=8 (> num_positions=6, exercising the
    # zero-padded bias branch).  B=16 -> a single grid step with 128 rows.
    B, S, D = 16, 8, 32
    num_heads = 4
    num_positions = 6

    key = jax.random.PRNGKey(0)
    k_x, k_p = jax.random.split(key)
    x = jax.random.normal(k_x, (B, S, D), jnp.float32)
    params = init_params(k_p, D)

    # property_bias init exactly as in __init__: zeros with bias[0, :, :3] = 0.1
    property_bias = jnp.zeros((num_heads, num_positions, num_positions),
                              jnp.float32).at[0, :, :3].set(0.1)

    ref = reference_attention(x, params, num_heads, property_bias)

    # f32 path (exact up to the approx softmax reciprocal).
    out = property_focused_attention(x, params, num_heads, property_bias,
                                     compute_dtype=jnp.float32)
    out = jax.block_until_ready(out)
    assert out.shape == (B, S, D)
    assert jnp.allclose(out, ref, atol=1e-2, rtol=1e-2), (
        float(jnp.max(jnp.abs(out - ref))))

    # Chip-default path (bf16 matmul inputs on v6e/v7x, f32 on v5e and older).
    out_d = property_focused_attention(x, params, num_heads, property_bias)
    out_d = jax.block_until_ready(out_d)
    assert out_d.shape == (B, S, D)
    assert jnp.allclose(out_d, ref, atol=1e-1, rtol=1e-1), (
        float(jnp.max(jnp.abs(out_d - ref))))

    print("KERNEL_OK")
</pallas_src>

<mosaic_0001>
module attributes {stable_mosaic.version = 11 : i64} {
  func.func @kernel(%arg0: i32, %arg1: memref<128x32xf32, #tpu.memory_space<vmem>>, %arg2: memref<32x96xf32, #tpu.memory_space<vmem>>, %arg3: memref<1x96xf32, #tpu.memory_space<vmem>>, %arg4: memref<32x32xf32, #tpu.memory_space<vmem>>, %arg5: memref<1x32xf32, #tpu.memory_space<vmem>>, %arg6: memref<8x32xf32, #tpu.memory_space<vmem>>, %arg7: memref<32x32xf32, #tpu.memory_space<vmem>>, %arg8: memref<32x32xf32, #tpu.memory_space<vmem>>, %arg9: memref<128x32xf32, #tpu.memory_space<vmem>>) attributes {dimension_semantics = [#tpu.dimension_semantics<parallel>], iteration_bounds = array<i64: 1>, scalar_prefetch = 0 : i64, scratch_operands = 0 : i64, tpu.core_type = #tpu.core_type<tc>, window_params = [{transform_indices = @transform_0, window_bounds = array<i64: 128, 32>}, {pipeline_mode = #tpu.pipeline_mode<synchronous>, transform_indices = @transform_1, window_bounds = array<i64: 32, 96>}, {pipeline_mode = #tpu.pipeline_mode<synchronous>, transform_indices = @transform_2, window_bounds = array<i64: 1, 96>}, {pipeline_mode = #tpu.pipeline_mode<synchronous>, transform_indices = @transform_3, window_bounds = array<i64: 32, 32>}, {pipeline_mode = #tpu.pipeline_mode<synchronous>, transform_indices = @transform_4, window_bounds = array<i64: 1, 32>}, {pipeline_mode = #tpu.pipeline_mode<synchronous>, transform_indices = @transform_5, window_bounds = array<i64: 8, 32>}, {pipeline_mode = #tpu.pipeline_mode<synchronous>, transform_indices = @transform_6, window_bounds = array<i64: 32, 32>}, {pipeline_mode = #tpu.pipeline_mode<synchronous>, transform_indices = @transform_7, window_bounds = array<i64: 32, 32>}, {transform_indices = @transform_8, window_bounds = array<i64: 128, 32>}]} {
    %c0 = arith.constant 0 : index
    %c0_0 = arith.constant 0 : index
    %0 = vector.load %arg1[%c0, %c0_0] : memref<128x32xf32, #tpu.memory_space<vmem>>, vector<128x32xf32>
    %c0_1 = arith.constant 0 : index
    %c0_2 = arith.constant 0 : index
    %1 = vector.load %arg2[%c0_1, %c0_2] : memref<32x96xf32, #tpu.memory_space<vmem>>, vector<32x96xf32>
    %cst = arith.constant dense<0.000000e+00> : vector<128x96xf32>
    %2 = tpu.matmul %0, %1, %cst {dimension_numbers = #tpu.dot_dimension_numbers<[1], [0], [0], [1], [0, 0, 1, 1], [], []>} : vector<128x32xf32>, vector<32x96xf32>, vector<128x96xf32> -> vector<128x96xf32>
    %c0_3 = arith.constant 0 : index
    %c0_4 = arith.constant 0 : index
    %3 = vector.load %arg3[%c0_3, %c0_4] : memref<1x96xf32, #tpu.memory_space<vmem>>, vector<1x96xf32>
    %4 = vector.broadcast %3 : vector<1x96xf32> to vector<128x96xf32>
    %5 = arith.addf %2, %4 : vector<128x96xf32>
    %6 = vector.extract_strided_slice %5 {offsets = [0, 0], sizes = [128, 32], strides = [1, 1]} : vector<128x96xf32> to vector<128x32xf32>
    %7 = vector.shape_cast %6 : vector<128x32xf32> to vector<16x8x32xf32>
    %8 = vector.extract_strided_slice %5 {offsets = [0, 32], sizes = [128, 32], strides = [1, 1]} : vector<128x96xf32> to vector<128x32xf32>
    %9 = vector.shape_cast %8 : vector<128x32xf32> to vector<16x8x32xf32>
    %10 = vector.extract_strided_slice %5 {offsets = [0, 64], sizes = [128, 32], strides = [1, 1]} : vector<128x96xf32> to vector<128x32xf32>
    %11 = vector.shape_cast %10 : vector<128x32xf32> to vector<16x8x32xf32>
    %c0_5 = arith.constant 0 : index
    %c0_6 = arith.constant 0 : index
    %12 = vector.load %arg7[%c0_5, %c0_6] : memref<32x32xf32, #tpu.memory_space<vmem>>, vector<32x32xf32>
    %13 = tpu.concatenate %9, %9, %9, %9 in 1 : vector<16x8x32xf32>, vector<16x8x32xf32>, vector<16x8x32xf32>, vector<16x8x32xf32> -> vector<16x32x32xf32>
    %14 = vector.shape_cast %12 : vector<32x32xf32> to vector<1x32x32xf32>
    %15 = vector.broadcast %14 : vector<1x32x32xf32> to vector<16x32x32xf32>
    %16 = arith.mulf %13, %15 : vector<16x32x32xf32>
    %17 = tpu.concatenate %11, %11, %11, %11 in 1 : vector<16x8x32xf32>, vector<16x8x32xf32>, vector<16x8x32xf32>, vector<16x8x32xf32> -> vector<16x32x32xf32>
    %18 = vector.shape_cast %12 : vector<32x32xf32> to vector<1x32x32xf32>
    %19 = vector.broadcast %18 : vector<1x32x32xf32> to vector<16x32x32xf32>
    %20 = arith.mulf %17, %19 : vector<16x32x32xf32>
    "tpu.trace_start"() <{level = 10 : i32, message = "bqd,bnd->bqn"}> : () -> ()
    %cst_7 = arith.constant dense<0.000000e+00> : vector<16x8x32xf32>
    %21 = tpu.matmul %7, %16, %cst_7 {dimension_numbers = #tpu.dot_dimension_numbers<[2], [2], [1], [1], [0, 0, 0, 1, 1, 1], [0], [0]>} : vector<16x8x32xf32>, vector<16x32x32xf32>, vector<16x8x32xf32> -> vector<16x8x32xf32>
    "tpu.trace_stop"() : () -> ()
    %c0_8 = arith.constant 0 : index
    %c0_9 = arith.constant 0 : index
    %22 = vector.load %arg6[%c0_8, %c0_9] : memref<8x32xf32, #tpu.memory_space<vmem>>, vector<8x32xf32>
    %23 = vector.shape_cast %22 : vector<8x32xf32> to vector<1x8x32xf32>
    %24 = vector.broadcast %23 : vector<1x8x32xf32> to vector<16x8x32xf32>
    %25 = arith.addf %21, %24 : vector<16x8x32xf32>
    %cst_10 = arith.constant dense<0xFF800000> : vector<16x8xf32>
    %26 = vector.multi_reduction <maximumf>, %25, %cst_10 [2] : vector<16x8x32xf32> to vector<16x8xf32>
    %27 = vector.shape_cast %26 : vector<16x8xf32> to vector<16x8x1xf32>
    %28 = vector.broadcast %27 : vector<16x8x1xf32> to vector<16x8x32xf32>
    %29 = arith.subf %25, %28 : vector<16x8x32xf32>
    %30 = math.exp %29 : vector<16x8x32xf32>
    %31 = vector.shape_cast %30 : vector<16x8x32xf32> to vector<128x32xf32>
    %c0_11 = arith.constant 0 : index
    %c0_12 = arith.constant 0 : index
    %32 = vector.load %arg8[%c0_11, %c0_12] : memref<32x32xf32, #tpu.memory_space<vmem>>, vector<32x32xf32>
    %cst_13 = arith.constant dense<0.000000e+00> : vector<128x32xf32>
    %33 = tpu.matmul %31, %32, %cst_13 {dimension_numbers = #tpu.dot_dimension_numbers<[1], [0], [0], [1], [0, 0, 1, 1], [], []>} : vector<128x32xf32>, vector<32x32xf32>, vector<128x32xf32> -> vector<128x32xf32>
    %34 = tpu.reciprocal %33 {approx = true} : vector<128x32xf32> -> vector<128x32xf32>
    %35 = arith.mulf %31, %34 : vector<128x32xf32>
    %36 = vector.shape_cast %35 : vector<128x32xf32> to vector<16x8x32xf32>
    "tpu.trace_start"() <{level = 10 : i32, message = "bqn,bnd->bqd"}> : () -> ()
    %cst_14 = arith.constant dense<0.000000e+00> : vector<16x8x32xf32>
    %37 = tpu.matmul %36, %20, %cst_14 {dimension_numbers = #tpu.dot_dimension_numbers<[2], [1], [1], [2], [0, 0, 0, 1, 1, 2], [0], [0]>} : vector<16x8x32xf32>, vector<16x32x32xf32>, vector<16x8x32xf32> -> vector<16x8x32xf32>
    "tpu.trace_stop"() : () -> ()
    %38 = vector.shape_cast %37 : vector<16x8x32xf32> to vector<128x32xf32>
    %c0_15 = arith.constant 0 : index
    %c0_16 = arith.constant 0 : index
    %39 = vector.load %arg4[%c0_15, %c0_16] : memref<32x32xf32, #tpu.memory_space<vmem>>, vector<32x32xf32>
    %cst_17 = arith.constant dense<0.000000e+00> : vector<128x32xf32>
    %40 = tpu.matmul %38, %39, %cst_17 {dimension_numbers = #tpu.dot_dimension_numbers<[1], [0], [0], [1], [0, 0, 1, 1], [], []>} : vector<128x32xf32>, vector<32x32xf32>, vector<128x32xf32> -> vector<128x32xf32>
    %c0_18 = arith.constant 0 : index
    %c0_19 = arith.constant 0 : index
    %41 = vector.load %arg5[%c0_18, %c0_19] : memref<1x32xf32, #tpu.memory_space<vmem>>, vector<1x32xf32>
    %42 = vector.broadcast %41 : vector<1x32xf32> to vector<128x32xf32>
    %43 = arith.addf %40, %42 : vector<128x32xf32>
    %c0_20 = arith.constant 0 : index
    %c0_21 = arith.constant 0 : index
    %44 = vector.load %arg9[%c0_20, %c0_21] : memref<128x32xf32, #tpu.memory_space<vmem>>, vector<128x32xf32>
    tpu.vector_store %arg9[%c0_20, %c0_21], %43 {strides = array<i32>} : memref<128x32xf32, #tpu.memory_space<vmem>>, vector<128x32xf32>,
    return
  }
  func.func @transform_0(%arg0: i32) -> (i32, i32) {
    %c0_i32 = arith.constant 0 : i32
    %c0_i32_0 = arith.constant 0 : i32
    return %arg0, %c0_i32 : i32, i32
  }
  func.func @transform_1(%arg0: i32) -> (i32, i32) {
    %c0_i32 = arith.constant 0 : i32
    %c0_i32_0 = arith.constant 0 : i32
    %c0_i32_1 = arith.constant 0 : i32
    return %c0_i32, %c0_i32_0 : i32, i32
  }
  func.func @transform_2(%arg0: i32) -> (i32, i32) {
    %c0_i32 = arith.constant 0 : i32
    %c0_i32_0 = arith.constant 0 : i32
    %c0_i32_1 = arith.constant 0 : i32
    return %c0_i32, %c0_i32_0 : i32, i32
  }
  func.func @transform_3(%arg0: i32) -> (i32, i32) {
    %c0_i32 = arith.constant 0 : i32
    %c0_i32_0 = arith.constant 0 : i32
    %c0_i32_1 = arith.constant 0 : i32
    return %c0_i32, %c0_i32_0 : i32, i32
  }
  func.func @transform_4(%arg0: i32) -> (i32, i32) {
    %c0_i32 = arith.constant 0 : i32
    %c0_i32_0 = arith.constant 0 : i32
    %c0_i32_1 = arith.constant 0 : i32
    return %c0_i32, %c0_i32_0 : i32, i32
  }
  func.func @transform_5(%arg0: i32) -> (i32, i32) {
    %c0_i32 = arith.constant 0 : i32
    %c0_i32_0 = arith.constant 0 : i32
    %c0_i32_1 = arith.constant 0 : i32
    return %c0_i32, %c0_i32_0 : i32, i32
  }
  func.func @transform_6(%arg0: i32) -> (i32, i32) {
    %c0_i32 = arith.constant 0 : i32
    %c0_i32_0 = arith.constant 0 : i32
    %c0_i32_1 = arith.constant 0 : i32
    return %c0_i32, %c0_i32_0 : i32, i32
  }
  func.func @transform_7(%arg0: i32) -> (i32, i32) {
    %c0_i32 = arith.constant 0 : i32
    %c0_i32_0 = arith.constant 0 : i32
    %c0_i32_1 = arith.constant 0 : i32
    return %c0_i32, %c0_i32_0 : i32, i32
  }
  func.func @transform_8(%arg0: i32) -> (i32, i32) {
    %c0_i32 = arith.constant 0 : i32
    %c0_i32_0 = arith.constant 0 : i32
    return %arg0, %c0_i32 : i32, i32
  }
}

</mosaic_0001>

<bundles_post_ra>
// kernel: tpu_custom_call.1
= control target key start
LH: loop header
LB: loop body
LE: loop exit
PB: predicated region body
PF: predicated region fallthrough
CT: control target
= control target key end

     0   :  { %s2407_s17 = smov 32   ;;  %vm53_vm0 = vcmask 261120   ;;  %s2409_s16 = smov 64   ;;  %s3567_s1 = inlined_call_operand.vmem [shape: f32[32,96], index: 1, kind: input, shape index: {}]   ;;  %s3568_s6 = inlined_call_operand.vmem [shape: f32[32,32], index: 6, kind: input, shape index: {}]   ;;  %s3569_s0 = inlined_call_operand.vmem [shape: f32[128,32], index: 0, kind: input, shape index: {}]   ;;  %s3570_s2 = inlined_call_operand.vmem [shape: f32[1,96], index: 2, kind: input, shape index: {}]   ;;  %s3571_s5 = inlined_call_operand.vmem [shape: f32[8,32], index: 5, kind: input, shape index: {}]   ;;  %s3572_s7 = inlined_call_operand.vmem [shape: f32[32,32], index: 7, kind: input, shape index: {}]   ;;  %s3573_s3 = inlined_call_operand.vmem [shape: f32[32,32], index: 3, kind: input, shape index: {}]   ;;  %s3574_s4 = inlined_call_operand.vmem [shape: f32[1,32], index: 4, kind: input, shape index: {}]   ;;  %s3575_s8 = inlined_call_operand.vmem [shape: f32[128,32], index: 8, kind: output, shape index: {}]  }
   0x1   :  { %v48_v0 = vld [vmem:[%s3567_s1 + $0x18] sm:$0xff]  ;;  %v47_v1 = vld [vmem:[%s3567_s1 + $0x10] sm:$0xff]  ;;  %v46_v2 = vld [vmem:[%s3567_s1 + $0x8] sm:$0xff] }
   0x2   :  { %114 = vmatpush.msra.mxu0 %v48_v0  ;;  %2170 = vmatpush.msra.mxu1 %v48_v0  ;;  %v2467_v3 = vld [vmem:[%s3568_s6 + $0x18] sm:$0xff]  ;;  %v2472_v4 = vld [vmem:[%s3568_s6 + $0x8] sm:$0xff]  ;;  %v45_v5 = vld [vmem:[%s3567_s1] sm:$0xff] }
   0x3   :  { %2171 = vmatpush.msra.mxu3 %v48_v0  ;;  %181 = vrot.lane.b32.xlu0 %v2467_v3, %s2407_s17  ;;  %v29_v6 = vld [vmem:[%s3569_s0] sm:$0xff]  ;;  %v35_v7 = vld [vmem:[%s3569_s0 + $0x30] sm:$0xff]  ;;  %v42_v8 = vld [vmem:[%s3569_s0 + $0x68] sm:$0xff] }
   0x4   :  { %115 = vmatpush.msra.mxu0 %v47_v1  ;;  %2172 = vmatpush.msra.mxu1 %v47_v1  ;;  %v2494_v9 = vld [vmem:[%s3568_s6 + $0x10] sm:$0xff]  ;;  %v2499_v10 = vld [vmem:[%s3568_s6] sm:$0xff]  ;;  %v30_v11 = vld [vmem:[%s3569_s0 + $0x8] sm:$0xff] }
   0x5   :  { %2173 = vmatpush.msra.mxu3 %v47_v1  ;;  %177 = vrot.lane.b32.xlu1 %v2472_v4, %s2407_s17  ;;  %v36_v12 = vld [vmem:[%s3569_s0 + $0x38] sm:$0xff]  ;;  %v43_v13 = vld [vmem:[%s3569_s0 + $0x70] sm:$0xff]  ;;  %v37_v15 = vld [vmem:[%s3569_s0 + $0x40] sm:$0xff] }
   0x6   :  { %116 = vmatpush.msra.mxu0 %v46_v2  ;;  %2174 = vmatpush.msra.mxu1 %v46_v2  ;;  %v31_v14 = vld [vmem:[%s3569_s0 + $0x10] sm:$0xff]  ;;  %v44_v16 = vld [vmem:[%s3569_s0 + $0x78] sm:$0xff]  ;;  %v38_v18 = vld [vmem:[%s3569_s0 + $0x48] sm:$0xff] }
   0x7   :  { %2175 = vmatpush.msra.mxu3 %v46_v2  ;;  %v32_v17 = vld [vmem:[%s3569_s0 + $0x18] sm:$0xff]  ;;  %v33_v19 = vld [vmem:[%s3569_s0 + $0x20] sm:$0xff]  ;;  %v39_v20 = vld [vmem:[%s3569_s0 + $0x50] sm:$0xff] }
   0x8   :  { %117 = vmatpush.msra.mxu0 %v45_v5  ;;  %2176 = vmatpush.msra.mxu1 %v45_v5  ;;  %v34_v21 = vld [vmem:[%s3569_s0 + $0x28] sm:$0xff]  ;;  %v40_v22 = vld [vmem:[%s3569_s0 + $0x58] sm:$0xff]  ;;  %v41_v23 = vld [vmem:[%s3569_s0 + $0x60] sm:$0xff]  ;;  %s2408_s0 = smov 96  }
   0x9   :  { %2177 = vmatpush.msra.mxu3 %v45_v5  ;;  %2026 = vmatmul.msk.f32.vlgmr.msra.gmra.mxu0 %vm53_vm0, %v29_v6  ;;  %v2560_v25 = vld [vmem:[%s3570_s2] ss:$0 sm:$0xff] }
   0xa   :  { %2032 = vmatmul.msk.f32.vlgmr.msra.gmra.mxu1 %vm53_vm0, %v35_v7  ;;  %2039 = vmatmul.msk.f32.vlgmr.msra.gmra.mxu3 %vm53_vm0, %v42_v8 }
   0xb   :  { %179 = vrot.lane.b32.xlu0 %v2494_v9, %s2407_s17 }
   0xd   :  { %175 = vrot.lane.b32.xlu1 %v2499_v10, %s2407_s17 }
  0x11   :  { %2027 = vmatmul.msk.f32.gmra.mxu0 %vm53_vm0, %v30_v11 }
  0x12   :  { %2033 = vmatmul.msk.f32.gmra.mxu1 %vm53_vm0, %v36_v12  ;;  %2040 = vmatmul.msk.f32.gmra.mxu3 %vm53_vm0, %v43_v13 }
  0x19   :  { %2028 = vmatmul.msk.f32.gmra.mxu0 %vm53_vm0, %v31_v14 }
  0x1a   :  { %2034 = vmatmul.msk.f32.gmra.mxu1 %vm53_vm0, %v37_v15  ;;  %2041 = vmatmul.msk.f32.gmra.mxu3 %vm53_vm0, %v44_v16 }
  0x21   :  { %2029 = vmatmul.msk.f32.gmra.mxu0 %vm53_vm0, %v32_v17 }
  0x22   :  { %2035 = vmatmul.msk.f32.gmra.mxu1 %vm53_vm0, %v38_v18 }
  0x29   :  { %2030 = vmatmul.msk.f32.gmra.mxu0 %vm53_vm0, %v33_v19 }
  0x2a   :  { %2036 = vmatmul.msk.f32.gmra.mxu1 %vm53_vm0, %v39_v20 }
  0x31   :  { %2031 = vmatmul.msk.f32.gmra.mxu0 %vm53_vm0, %v34_v21 }
  0x32   :  { %2037 = vmatmul.msk.f32.gmra.mxu1 %vm53_vm0, %v40_v22 }
  0x3a   :  { %2038 = vmatmul.msk.f32.gmra.mxu1 %vm53_vm0, %v41_v23 }
  0x75   :  { %v2555_v24 = vpop.permute.xlu0 %181 }
  0x77   :  { %v2578_v34 = vpop.permute.xlu1 %177 }
  0x7d   :  { %v2562_v27 = vpop.permute.xlu0 %179 }
  0x7f   :  { %v2593_v41 = vpop.permute.xlu1 %175 }
  0x86   :  { %v119_v26 = vpop.f32.mrf.mxu0 }
  0x87   :  { %v2565_v28 = vadd.f32 %v2560_v25, %v119_v26  ;;  %v137_v29 = vpop.f32.mrf.mxu1 }
  0x88   :  { %v2568_v30 = vadd.f32 %v2560_v25, %v137_v29 }
  0x89   :  { %v190_v31 = vmul.f32 %v2555_v24, %v2565_v28  ;;  %v189_v32 = vmul.f32 %v2562_v27, %v2565_v28  ;;  %v188_v39 = vmul.f32 %v2578_v34, %v2565_v28  ;;  %v187_v44 = vmul.f32 %v2593_v41, %v2565_v28 }
  0x8a   :  { %v214_v33 = vmul.f32 %v2555_v24, %v2568_v30  ;;  %v213_v38 = vmul.f32 %v2562_v27, %v2568_v30  ;;  %v212_v49 = vmul.f32 %v2578_v34, %v2568_v30  ;;  %v211_v19 = vmul.f32 %v2593_v41, %v2568_v30 }
  0x8b   :  { %338 = vrot.lane.b32.xlu2 %v190_v31, %s2408_s0  ;;  %336 = vrot.lane.b32.xlu0 %v189_v32, %s2408_s0 }
  0x8c   :  { %596 = vrot.lane.b32.xlu1 %v214_v33, %s2408_s0 }
  0x8e   :  { %v122_v35 = vpop.f32.mrf.mxu0 }
  0x8f   :  { %v2582_v36 = vadd.f32 %v2560_v25, %v122_v35  ;;  %v140_v40 = vpop.f32.mrf.mxu1 }
  0x90   :  { %v2596_v42 = vadd.f32 %v2560_v25, %v140_v40 }
  0x91   :  { %v193_v37 = vmul.f32 %v2562_v27, %v2582_v36  ;;  %v192_v43 = vmul.f32 %v2578_v34, %v2582_v36  ;;  %v191_v48 = vmul.f32 %v2593_v41, %v2582_v36  ;;  %v194_v52 = vmul.f32 %v2555_v24, %v2582_v36 }
  0x92   :  { %v217_v45 = vmul.f32 %v2562_v27, %v2596_v42  ;;  %v216_v51 = vmul.f32 %v2578_v34, %v2596_v42  ;;  %v218_v58 = vmul.f32 %v2555_v24, %v2596_v42  ;;  %v215_v2 = vmul.f32 %v2593_v41, %v2596_v42 }
  0x93   :  { %594 = vrot.lane.b32.xlu0 %v213_v38, %s2408_s0  ;;  %334 = vrot.lane.b32.xlu2 %v188_v39, %s2408_s0  ;;  %v158_v38 = vpop.f32.mrf.mxu3 }
  0x94   :  { %379 = vrot.lane.b32.xlu1 %v193_v37, %s2408_s0  ;;  %v2720_v40 = vadd.f32 %v2560_v25, %v158_v38 }
  0x96   :  { %v125_v46 = vpop.f32.mrf.mxu0 }
  0x97   :  { %v2608_v47 = vadd.f32 %v2560_v25, %v125_v46  ;;  %v143_v54 = vpop.f32.mrf.mxu1 }
  0x98   :  { %v2629_v55 = vadd.f32 %v2560_v25, %v143_v54 }
  0x99   :  { %v198_v50 = vmul.f32 %v2555_v24, %v2608_v47  ;;  %v197_v53 = vmul.f32 %v2562_v27, %v2608_v47  ;;  %v195_v57 = vmul.f32 %v2593_v41, %v2608_v47  ;;  %v196_v63 = vmul.f32 %v2578_v34, %v2608_v47 }
  0x9a   :  { %v222_v59 = vmul.f32 %v2555_v24, %v2629_v55  ;;  %v221_v20 = vmul.f32 %v2562_v27, %v2629_v55  ;;  %v219_v22 = vmul.f32 %v2593_v41, %v2629_v55  ;;  %v220_v35 = vmul.f32 %v2578_v34, %v2629_v55 }
  0x9b   :  { %377 = vrot.lane.b32.xlu0 %v192_v43, %s2408_s0  ;;  %332 = vrot.lane.b32.xlu2 %v187_v44, %s2408_s0 }
  0x9c   :  { %637 = vrot.lane.b32.xlu1 %v217_v45, %s2408_s0  ;;  %v241_v45 = vmul.f32 %v2562_v27, %v2720_v40 }
  0x9e   :  { %v128_v56 = vpop.f32.mrf.mxu0 }
  0x9f   :  { %v2641_v60 = vadd.f32 %v2560_v25, %v128_v56  ;;  %v146_v17 = vpop.f32.mrf.mxu1 }
  0xa0   :  { %v2695_v21 = vadd.f32 %v2560_v25, %v146_v17 }
  0xa1   :  { %v201_v62 = vmul.f32 %v2562_v27, %v2641_v60  ;;  %v202_v0 = vmul.f32 %v2555_v24, %v2641_v60  ;;  %v200_v5 = vmul.f32 %v2578_v34, %v2641_v60  ;;  %v199_v12 = vmul.f32 %v2593_v41, %v2641_v60 }
  0xa2   :  { %v226_v26 = vmul.f32 %v2555_v24, %v2695_v21  ;;  %v225_v33 = vmul.f32 %v2562_v27, %v2695_v21 }
  0xa3   :  { %375 = vrot.lane.b32.xlu0 %v191_v48, %s2408_s0  ;;  %592 = vrot.lane.b32.xlu2 %v212_v49, %s2408_s0 }
  0xa4   :  { %424 = vrot.lane.b32.xlu1 %v198_v50, %s2408_s0 }
  0xa6   :  { %v131_v61 = vpop.f32.mrf.mxu0 }
  0xa7   :  { %v2653_v1 = vadd.f32 %v2560_v25, %v131_v61  ;;  %v149_v29 = vpop.f32.mrf.mxu1 }
  0xa8   :  { %v2707_v32 = vadd.f32 %v2560_v25, %v149_v29 }
  0xa9   :  { %v205_v6 = vmul.f32 %v2562_v27, %v2653_v1  ;;  %v204_v11 = vmul.f32 %v2578_v34, %v2653_v1  ;;  %v203_v14 = vmul.f32 %v2593_v41, %v2653_v1  ;;  %v206_v15 = vmul.f32 %v2555_v24, %v2653_v1 }
  0xaa   :  { %v229_v37 = vmul.f32 %v2562_v27, %v2707_v32  ;;  %v228_v43 = vmul.f32 %v2578_v34, %v2707_v32  ;;  %v230_v44 = vmul.f32 %v2555_v24, %v2707_v32  ;;  %v227_v50 = vmul.f32 %v2593_v41, %v2707_v32 }
  0xab   :  { %635 = vrot.lane.b32.xlu0 %v216_v51, %s2408_s0  ;;  %381 = vrot.lane.b32.xlu2 %v194_v52, %s2408_s0  ;;  %v224_v51 = vmul.f32 %v2578_v34, %v2695_v21 }
  0xac   :  { %422 = vrot.lane.b32.xlu1 %v197_v53, %s2408_s0 }
  0xae   :  { %v134_v7 = vpop.f32.mrf.mxu0 }
  0xaf   :  { %v2665_v8 = vadd.f32 %v2560_v25, %v134_v7  ;;  %v152_v46 = vpop.f32.mrf.mxu1 }
  0xb0   :  { %v2732_v49 = vadd.f32 %v2560_v25, %v152_v46 }
  0xb1   :  { %v210_v13 = vmul.f32 %v2555_v24, %v2665_v8  ;;  %v209_v16 = vmul.f32 %v2562_v27, %v2665_v8  ;;  %v207_v18 = vmul.f32 %v2593_v41, %v2665_v8  ;;  %v208_v23 = vmul.f32 %v2578_v34, %v2665_v8 }
  0xb2   :  { %v234_v52 = vmul.f32 %v2555_v24, %v2732_v49  ;;  %v233_v61 = vmul.f32 %v2562_v27, %v2732_v49  ;;  %v232_v17 = vmul.f32 %v2578_v34, %v2732_v49 }
  0xb3   :  { %418 = vrot.lane.b32.xlu0 %v195_v57, %s2408_s0  ;;  %639 = vrot.lane.b32.xlu2 %v218_v58, %s2408_s0  ;;  %v231_v57 = vmul.f32 %v2593_v41, %v2732_v49  ;;  %v223_v58 = vmul.f32 %v2593_v41, %v2695_v21 }
  0xb4   :  { %682 = vrot.lane.b32.xlu1 %v222_v59, %s2408_s0 }
  0xb7   :  { %v155_v59 = vpop.f32.mrf.mxu1 }
  0xbb   :  { %465 = vrot.lane.b32.xlu0 %v201_v62, %s2408_s0  ;;  %420 = vrot.lane.b32.xlu2 %v196_v63, %s2408_s0  ;;  %v2759_v62 = vadd.f32 %v2560_v25, %v155_v59 }
  0xbc   :  { %467 = vrot.lane.b32.xlu1 %v202_v0, %s2408_s0 }
  0xbd   :  { %v238_v7 = vmul.f32 %v2555_v24, %v2759_v62 }
  0xc3   :  { %633 = vrot.lane.b32.xlu0 %v215_v2, %s2408_s0  ;;  %463 = vrot.lane.b32.xlu2 %v200_v5, %s2408_s0  ;;  %v237_v5 = vmul.f32 %v2562_v27, %v2759_v62 }
  0xc4   :  { %508 = vrot.lane.b32.xlu1 %v205_v6, %s2408_s0  ;;  %v242_v6 = vmul.f32 %v2555_v24, %v2720_v40 }
  0xcb   :  { %506 = vrot.lane.b32.xlu0 %v204_v11, %s2408_s0  ;;  %461 = vrot.lane.b32.xlu2 %v199_v12, %s2408_s0  ;;  %v161_v11 = vpop.f32.mrf.mxu3 }
  0xcc   :  { %553 = vrot.lane.b32.xlu1 %v210_v13, %s2408_s0 }
  0xd3   :  { %504 = vrot.lane.b32.xlu0 %v203_v14, %s2408_s0  ;;  %510 = vrot.lane.b32.xlu2 %v206_v15, %s2408_s0  ;;  %v2780_v14 = vadd.f32 %v2560_v25, %v161_v11 }
  0xd4   :  { %551 = vrot.lane.b32.xlu1 %v209_v16, %s2408_s0  ;;  %v240_v16 = vmul.f32 %v2578_v34, %v2720_v40 }
  0xd5   :  { %v245_v29 = vmul.f32 %v2562_v27, %v2780_v14 }
  0xdb   :  { %547 = vrot.lane.b32.xlu0 %v207_v18, %s2408_s0  ;;  %590 = vrot.lane.b32.xlu2 %v211_v19, %s2408_s0  ;;  %v246_v18 = vmul.f32 %v2555_v24, %v2780_v14 }
  0xdc   :  { %680 = vrot.lane.b32.xlu1 %v221_v20, %s2408_s0 }
  0xe3   :  { %676 = vrot.lane.b32.xlu0 %v219_v22, %s2408_s0  ;;  %549 = vrot.lane.b32.xlu2 %v208_v23, %s2408_s0  ;;  %v239_v23 = vmul.f32 %v2593_v41, %v2720_v40 }
  0xe4   :  { %725 = vrot.lane.b32.xlu1 %v226_v26, %s2408_s0  ;;  %v236_v26 = vmul.f32 %v2578_v34, %v2759_v62 }
  0xe5   :  { %v339_v31 = vpop.permute.xlu2 %338 }
  0xe6   :  { %2042 = vmatpush.xpose.msk.msrb.mxu1 %vm53_vm0, %v339_v31  ;;  %v164_v31 = vpop.f32.mrf.mxu3 }
  0xeb   :  { %723 = vrot.lane.b32.xlu0 %v225_v33, %s2408_s0  ;;  %678 = vrot.lane.b32.xlu2 %v220_v35, %s2408_s0 }
  0xec   :  { %766 = vrot.lane.b32.xlu1 %v229_v37, %s2408_s0  ;;  %v2808_v37 = vadd.f32 %v2560_v25, %v164_v31 }
  0xed   :  { %v335_v39 = vpop.permute.xlu2 %334 }
  0xf3   :  { %764 = vrot.lane.b32.xlu0 %v228_v43, %s2408_s0  ;;  %768 = vrot.lane.b32.xlu2 %v230_v44, %s2408_s0  ;;  %v250_v43 = vmul.f32 %v2555_v24, %v2808_v37  ;;  %v235_v44 = vmul.f32 %v2593_v41, %v2759_v62  ;;  %v247_v24 = vmul.f32 %v2593_v41, %v2808_v37 }
  0xf4   :  { %895 = vrot.lane.b32.xlu1 %v241_v45, %s2408_s0 }
  0xf5   :  { %v333_v48 = vpop.permute.xlu2 %332 }
  0xfb   :  { %762 = vrot.lane.b32.xlu0 %v227_v50, %s2408_s0  ;;  %721 = vrot.lane.b32.xlu2 %v224_v51, %s2408_s0  ;;  %v244_v50 = vmul.f32 %v2578_v34, %v2780_v14 }
  0xfc   :  { %811 = vrot.lane.b32.xlu1 %v234_v52, %s2408_s0 }
  0xfd   :  { %v337_v53 = vpop.permute.xlu0 %336  ;;  %v2743_v54 = vpop.permute.xlu2 %592 }
  0xfe   :  { %v2745_v56 = vpop.permute.xlu1 %596  ;;  %2043 = vmatpush.xpose.msk.msrb.mxu1 %vm53_vm0, %v337_v53 }
 0x102   :  { %2044 = vmatpush.xpose.msk.msrb.mxu1 %vm53_vm0, %v335_v39  ;;  %v243_v39 = vmul.f32 %v2593_v41, %v2780_v14 }
 0x103   :  { %805 = vrot.lane.b32.xlu0 %v231_v57, %s2408_s0  ;;  %719 = vrot.lane.b32.xlu2 %v223_v58, %s2408_s0  ;;  %v249_v57 = vmul.f32 %v2562_v27, %v2808_v37 }
 0x104   :  { %809 = vrot.lane.b32.xlu1 %v233_v61, %s2408_s0 }
 0x105   :  { %v2761_v63 = vpop.permute.xlu0 %594  ;;  %v382_v0 = vpop.permute.xlu2 %381 }
 0x106   :  { %v380_v2 = vpop.permute.xlu1 %379  ;;  %2045 = vmatpush.xpose.msk.msrb.mxu1 %vm53_vm0, %v333_v48  ;;  %2047 = vmatpush.xpose.msk.msrb.mxu3 %vm53_vm0, %v382_v0  ;;  %v248_v48 = vmul.f32 %v2578_v34, %v2808_v37 }
 0x109   :  { %2046 = vmatmul.msk.f32.vlgmr.msrb.gmra.mxu1 %vm53_vm0, %v2565_v28 }
 0x10a   :  { %2048 = vmatpush.xpose.msk.msrb.mxu3 %vm53_vm0, %v380_v2 }
 0x10b   :  { %852 = vrot.lane.b32.xlu0 %v237_v5, %s2408_s0  ;;  %897 = vrot.lane.b32.xlu2 %v242_v6, %s2408_s0 }
 0x10c   :  { %854 = vrot.lane.b32.xlu1 %v238_v7, %s2408_s0 }
 0x10d   :  { %v378_v12 = vpop.permute.xlu0 %377  ;;  %v2777_v13 = vpop.permute.xlu2 %639 }
 0x10e   :  { %v2782_v15 = vpop.permute.xlu1 %637  ;;  %2049 = vmatpush.xpose.msk.msrb.mxu3 %vm53_vm0, %v378_v12 }
 0x113   :  { %893 = vrot.lane.b32.xlu0 %v240_v16, %s2408_s0  ;;  %807 = vrot.lane.b32.xlu2 %v232_v17, %s2408_s0 }
 0x114   :  { %940 = vrot.lane.b32.xlu1 %v246_v18, %s2408_s0 }
 0x115   :  { %v376_v19 = vpop.permute.xlu0 %375  ;;  %v421_v20 = vpop.permute.xlu2 %420 }
 0x116   :  { %v425_v22 = vpop.permute.xlu1 %424  ;;  %2050 = vmatpush.xpose.msk.msrb.mxu3 %vm53_vm0, %v376_v19 }
 0x119   :  { %2051 = vmatmul.msk.f32.vlgmr.msrb.gmra.mxu3 %vm53_vm0, %v2582_v36 }
 0x11a   :  { %2052 = vmatpush.xpose.msk.msra.mxu3 %vm53_vm0, %v425_v22 }
 0x11b   :  { %891 = vrot.lane.b32.xlu0 %v239_v23, %s2408_s0  ;;  %850 = vrot.lane.b32.xlu2 %v236_v26, %s2408_s0 }
 0x11c   :  { %938 = vrot.lane.b32.xlu1 %v245_v29, %s2408_s0 }
 0x11d   :  { %v636_v33 = vpop.permute.xlu0 %635  ;;  %v464_v35 = vpop.permute.xlu2 %463 }
 0x11e   :  { %v423_v38 = vpop.permute.xlu1 %422 }
 0x11f   :  { %2053 = vmatpush.xpose.msk.msra.mxu3 %vm53_vm0, %v423_v38  ;;  %v2902_v38 = vld [vmem:[%s3571_s5] sm:$0xff] }
 0x123   :  { %2054 = vmatpush.xpose.msk.msra.mxu3 %vm53_vm0, %v421_v20  ;;  %934 = vrot.lane.b32.xlu0 %v243_v39, %s2408_s0 }
 0x124   :  { %983 = vrot.lane.b32.xlu1 %v250_v43, %s2408_s0  ;;  %848 = vrot.lane.b32.xlu2 %v235_v44, %s2408_s0 }
 0x125   :  { %v419_v25 = vpop.permute.xlu0 %418  ;;  %v462_v45 = vpop.permute.xlu2 %461 }
 0x126   :  { %v683_v46 = vpop.permute.xlu1 %682 }
 0x127   :  { %2055 = vmatpush.xpose.msk.msra.mxu3 %vm53_vm0, %v419_v25 }
 0x12a   :  { %2056 = vmatmul.msk.f32.vlgmr.msra.gmra.mxu3 %vm53_vm0, %v2608_v47 }
 0x12b   :  { %979 = vrot.lane.b32.xlu0 %v248_v48, %s2408_s0 }
 0x12c   :  { %977 = vrot.lane.b32.xlu1 %v247_v24, %s2408_s0  ;;  %936 = vrot.lane.b32.xlu2 %v244_v50, %s2408_s0 }
 0x12d   :  { %v466_v51 = vpop.permute.xlu0 %465  ;;  %v511_v52 = vpop.permute.xlu2 %510 }
 0x12e   :  { %v468_v53 = vpop.permute.xlu1 %467  ;;  %2062 = vmatpush.xpose.msk.msra.mxu2 %vm53_vm0, %v511_v52 }
 0x12f   :  { %2057 = vmatpush.xpose.msk.msra.mxu1 %vm53_vm0, %v468_v53 }
 0x133   :  { %2058 = vmatpush.xpose.msk.msra.mxu1 %vm53_vm0, %v466_v51 }
 0x134   :  { %981 = vrot.lane.b32.xlu2 %v249_v57, %s2408_s0 }
 0x135   :  { %v634_v34 = vpop.permute.xlu0 %633  ;;  %v591_v41 = vpop.permute.xlu2 %590 }
 0x136   :  { %v509_v58 = vpop.permute.xlu1 %508 }
 0x137   :  { %2059 = vmatpush.xpose.msk.msra.mxu1 %vm53_vm0, %v464_v35  ;;  %2063 = vmatpush.xpose.msk.msra.mxu2 %vm53_vm0, %v509_v58 }
 0x13b   :  { %2060 = vmatpush.xpose.msk.msra.mxu1 %vm53_vm0, %v462_v45 }
 0x13d   :  { %v507_v59 = vpop.permute.xlu0 %506  ;;  %v550_v61 = vpop.permute.xlu2 %549 }
 0x13e   :  { %v554_v0 = vpop.permute.xlu1 %553  ;;  %2061 = vmatmul.msk.f32.vlgmr.msra.gmra.mxu1 %vm53_vm0, %v2641_v60  ;;  %2064 = vmatpush.xpose.msk.msra.mxu2 %vm53_vm0, %v507_v59 }
 0x13f   :  { %2072 = vmatpush.xpose.msk.msrb.mxu1 %vm53_vm0, %v2745_v56  ;;  %2067 = vmatpush.xpose.msk.msrb.mxu3 %vm53_vm0, %v554_v0 }
 0x143   :  { %2073 = vmatpush.xpose.msk.msrb.mxu1 %vm53_vm0, %v2761_v63 }
 0x145   :  { %v505_v27 = vpop.permute.xlu0 %504  ;;  %v679_v2 = vpop.permute.xlu2 %678 }
 0x146   :  { %v552_v5 = vpop.permute.xlu1 %551  ;;  %2065 = vmatpush.xpose.msk.msra.mxu2 %vm53_vm0, %v505_v27 }
 0x147   :  { %2074 = vmatpush.xpose.msk.msrb.mxu1 %vm53_vm0, %v2743_v54  ;;  %2068 = vmatpush.xpose.msk.msrb.mxu3 %vm53_vm0, %v552_v5 }
 0x149   :  { %2066 = vmatmul.msk.f32.vlgmr.msra.gmra.mxu2 %vm53_vm0, %v2653_v1 }
 0x14a   :  { %2077 = vmatpush.xpose.msk.msrb.mxu2 %vm53_vm0, %v2777_v13 }
 0x14b   :  { %2075 = vmatpush.xpose.msk.msrb.mxu1 %vm53_vm0, %v591_v41  ;;  %2069 = vmatpush.xpose.msk.msrb.mxu3 %vm53_vm0, %v550_v61 }
 0x14d   :  { %v548_v54 = vpop.permute.xlu0 %547  ;;  %v769_v56 = vpop.permute.xlu2 %768 }
 0x14e   :  { %2076 = vmatmul.msk.f32.vlgmr.msrb.gmra.mxu1 %vm53_vm0, %v2568_v30  ;;  %2078 = vmatpush.xpose.msk.msrb.mxu2 %vm53_vm0, %v2782_v15  ;;  %v681_v63 = vpop.permute.xlu1 %680 }
 0x14f   :  { %2070 = vmatpush.xpose.msk.msrb.mxu3 %vm53_vm0, %v548_v54 }
 0x152   :  { %2079 = vmatpush.xpose.msk.msrb.mxu2 %vm53_vm0, %v636_v33  ;;  %2071 = vmatmul.msk.f32.vlgmr.msrb.gmra.mxu3 %vm53_vm0, %v2665_v8 }
 0x153   :  { %2082 = vmatpush.xpose.msk.msra.mxu3 %vm53_vm0, %v683_v46 }
 0x155   :  { %v677_v6 = vpop.permute.xlu0 %676  ;;  %v722_v7 = vpop.permute.xlu2 %721 }
 0x156   :  { %2080 = vmatpush.xpose.msk.msrb.mxu2 %vm53_vm0, %v634_v34  ;;  %v726_v11 = vpop.permute.xlu1 %725 }
 0x157   :  { %2083 = vmatpush.xpose.msk.msra.mxu3 %vm53_vm0, %v681_v63  ;;  %2087 = vmatpush.xpose.msk.msra.mxu1 %vm53_vm0, %v726_v11 }
 0x159   :  { %2081 = vmatmul.msk.f32.vlgmr.msrb.gmra.mxu2 %vm53_vm0, %v2596_v42 }
 0x15a   :  { %2092 = vmatpush.xpose.msk.msra.mxu2 %vm53_vm0, %v769_v56 }
 0x15b   :  { %2084 = vmatpush.xpose.msk.msra.mxu3 %vm53_vm0, %v679_v2 }
 0x15d   :  { %v724_v12 = vpop.permute.xlu0 %723  ;;  %v720_v15 = vpop.permute.xlu2 %719 }
 0x15e   :  { %v767_v13 = vpop.permute.xlu1 %766  ;;  %2088 = vmatpush.xpose.msk.msra.mxu1 %vm53_vm0, %v724_v12 }
 0x15f   :  { %2085 = vmatpush.xpose.msk.msra.mxu3 %vm53_vm0, %v677_v6  ;;  %2093 = vmatpush.xpose.msk.msra.mxu2 %vm53_vm0, %v767_v13 }
 0x162   :  { %2086 = vmatmul.msk.f32.vlgmr.msra.gmra.mxu3 %vm53_vm0, %v2629_v55  ;;  %2089 = vmatpush.xpose.msk.msra.mxu1 %vm53_vm0, %v722_v7 }
 0x165   :  { %v765_v16 = vpop.permute.xlu0 %764  ;;  %v898_v18 = vpop.permute.xlu2 %897 }
 0x166   :  { %v896_v17 = vpop.permute.xlu1 %895  ;;  %2090 = vmatpush.xpose.msk.msra.mxu1 %vm53_vm0, %v720_v15  ;;  %2094 = vmatpush.xpose.msk.msra.mxu2 %vm53_vm0, %v765_v16 }
 0x169   :  { %2091 = vmatmul.msk.f32.vlgmr.msra.gmra.mxu1 %vm53_vm0, %v2695_v21 }
 0x16d   :  { %v763_v19 = vpop.permute.xlu0 %762  ;;  %v808_v22 = vpop.permute.xlu2 %807 }
 0x16e   :  { %v812_v20 = vpop.permute.xlu1 %811  ;;  %2095 = vmatpush.xpose.msk.msra.mxu2 %vm53_vm0, %v763_v19  ;;  %v1115_v19 = vld [vmem:[%s3572_s7 + $0x18] sm:$0xff] }
 0x16f   :  { %2097 = vmatpush.xpose.msk.msrb.mxu3 %vm53_vm0, %v812_v20 }
 0x171   :  { %2096 = vmatmul.msk.f32.vlgmr.msra.gmra.mxu2 %vm53_vm0, %v2707_v32 }
 0x172   :  { %2107 = vmatpush.xpose.msk.msrb.mxu2 %vm53_vm0, %v898_v18 }
 0x175   :  { %v806_v23 = vpop.permute.xlu0 %805  ;;  %v851_v29 = vpop.permute.xlu2 %850 }
 0x176   :  { %2108 = vmatpush.xpose.msk.msrb.mxu2 %vm53_vm0, %v896_v17  ;;  %v810_v26 = vpop.permute.xlu1 %809 }
 0x177   :  { %2098 = vmatpush.xpose.msk.msrb.mxu3 %vm53_vm0, %v810_v26 }
 0x17b   :  { %2099 = vmatpush.xpose.msk.msrb.mxu3 %vm53_vm0, %v808_v22  ;;  %v1114_v22 = vld [vmem:[%s3572_s7 + $0x10] sm:$0xff] }
 0x17d   :  { %v853_v31 = vpop.permute.xlu0 %852 }
 0x17e   :  { %v855_v33 = vpop.permute.xlu1 %854  ;;  %v849_v39 = vpop.permute.xlu2 %848 }
 0x17f   :  { %2100 = vmatpush.xpose.msk.msrb.mxu3 %vm53_vm0, %v806_v23  ;;  %2102 = vmatpush.xpose.msk.msrb.mxu1 %vm53_vm0, %v855_v33  ;;  %v1113_v23 = vld [vmem:[%s3572_s7 + $0x8] sm:$0xff] }
 0x182   :  { %2101 = vmatmul.msk.f32.vlgmr.msrb.gmra.mxu3 %vm53_vm0, %v2732_v49 }
 0x183   :  { %2103 = vmatpush.xpose.msk.msrb.mxu1 %vm53_vm0, %v853_v31 }
 0x185   :  { %v894_v35 = vpop.permute.xlu0 %893 }
 0x186   :  { %v941_v43 = vpop.permute.xlu1 %940  ;;  %2109 = vmatpush.xpose.msk.msrb.mxu2 %vm53_vm0, %v894_v35  ;;  %v368_v44 = vpop.f32.mrf.mxu1 }
 0x187   :  { %2104 = vmatpush.xpose.msk.msrb.mxu1 %vm53_vm0, %v851_v29  ;;  %2112 = vmatpush.xpose.msk.msra.mxu3 %vm53_vm0, %v941_v43  ;;  %v2908_v25 = vadd.f32 %v368_v44, %v2902_v38  ;;  %v937_v24 = vpop.permute.xlu2 %936  ;;  %v1112_v29 = vld [vmem:[%s3572_s7] sm:$0xff] }
 0x189   :  { %v1016_v45 = vsel %vm53_vm0, %v2908_v25, -inf }
 0x18a   :  { %1017 = vmax.xlane.f32.xlu2 %v1016_v45 }
 0x18b   :  { %2105 = vmatpush.xpose.msk.msrb.mxu1 %vm53_vm0, %v849_v39 }
 0x18d   :  { %v892_v46 = vpop.permute.xlu0 %891 }
 0x18e   :  { %v939_v48 = vpop.permute.xlu1 %938  ;;  %2106 = vmatmul.msk.f32.vlgmr.msrb.gmra.mxu1 %vm53_vm0, %v2759_v62  ;;  %2110 = vmatpush.xpose.msk.msrb.mxu2 %vm53_vm0, %v892_v46 }
 0x18f   :  { %2113 = vmatpush.xpose.msk.msra.mxu3 %vm53_vm0, %v939_v48  ;;  %v982_v52 = vpop.permute.xlu2 %981 }
 0x191   :  { %2111 = vmatmul.msk.f32.vlgmr.msrb.gmra.mxu2 %vm53_vm0, %v2720_v40 }
 0x192   :  { %1176 = vmatpush.msra.mxu2 %v1115_v19 }
 0x193   :  { %2114 = vmatpush.xpose.msk.msra.mxu3 %vm53_vm0, %v937_v24 }
 0x194   :  { %1177 = vmatpush.msra.mxu2 %v1114_v22 }
 0x195   :  { %v935_v50 = vpop.permute.xlu0 %934 }
 0x196   :  { %v984_v51 = vpop.permute.xlu1 %983  ;;  %1178 = vmatpush.msra.mxu2 %v1113_v23 }
 0x197   :  { %2115 = vmatpush.xpose.msk.msra.mxu3 %vm53_vm0, %v935_v50  ;;  %2117 = vmatpush.xpose.msk.msra.mxu1 %vm53_vm0, %v984_v51 }
 0x198   :  { %1179 = vmatpush.msra.mxu2 %v1112_v29 }
 0x19a   :  { %2116 = vmatmul.msk.f32.vlgmr.msra.gmra.mxu3 %vm53_vm0, %v2780_v14 }
 0x19b   :  { %2118 = vmatpush.xpose.msk.msra.mxu1 %vm53_vm0, %v982_v52 }
 0x19c   :  { %v411_v53 = vpop.f32.mrf.mxu3 }
 0x19d   :  { %v2926_v57 = vadd.f32 %v411_v53, %v2902_v38  ;;  %v980_v34 = vpop.permute.xlu0 %979 }
 0x19e   :  { %v978_v58 = vpop.permute.xlu1 %977 }
 0x19f   :  { %2119 = vmatpush.xpose.msk.msra.mxu1 %vm53_vm0, %v980_v34  ;;  %v1019_v41 = vsel %vm53_vm0, %v2926_v57, -inf }
 0x1a0   :  { %1020 = vmax.xlane.f32.xlu0 %v1019_v41 }
 0x1a3   :  { %2120 = vmatpush.xpose.msk.msra.mxu1 %vm53_vm0, %v978_v58 }
 0x1a6   :  { %2121 = vmatmul.msk.f32.vlgmr.msra.gmra.mxu1 %vm53_vm0, %v2808_v37 }
 0x1ad   :  { %v454_v59 = vpop.f32.mrf.mxu3 }
 0x1ae   :  { %v2935_v61 = vadd.f32 %v454_v59, %v2902_v38 }
 0x1b0   :  { %v1022_v0 = vsel %vm53_vm0, %v2935_v61, -inf }
 0x1b1   :  { %1023 = vmax.xlane.f32.xlu1 %v1022_v0 }
 0x1bb   :  { %v497_v27 = vpop.f32.mrf.mxu1 }
 0x1bc   :  { %v2940_v2 = vadd.f32 %v497_v27, %v2902_v38 }
 0x1be   :  { %v1025_v5 = vsel %vm53_vm0, %v2940_v2, -inf }
 0x1bf   :  { %1026 = vmax.xlane.f32.xlu2 %v1025_v5 }
 0x1cb   :  { %v626_v54 = vpop.f32.mrf.mxu1 }
 0x1cc   :  { %v2945_v56 = vadd.f32 %v626_v54, %v2902_v38  ;;  %v540_v6 = vpop.f32.mrf.mxu2 }
 0x1cd   :  { %v2950_v7 = vadd.f32 %v540_v6, %v2902_v38 }
 0x1ce   :  { %v1034_v63 = vsel %vm53_vm0, %v2945_v56, -inf }
 0x1cf   :  { %1035 = vmax.xlane.f32.xlu1 %v1034_v63  ;;  %v1028_v11 = vsel %vm53_vm0, %v2950_v7, -inf }
 0x1d0   :  { %1029 = vmax.xlane.f32.xlu2 %v1028_v11 }
 0x1d5   :  { %v583_v12 = vpop.f32.mrf.mxu3 }
 0x1d6   :  { %v2955_v13 = vadd.f32 %v583_v12, %v2902_v38 }
 0x1d8   :  { %v1031_v15 = vsel %vm53_vm0, %v2955_v13, -inf }
 0x1d9   :  { %1032 = vmax.xlane.f32.xlu0 %v1031_v15 }
 0x1dc   :  { %v669_v16 = vpop.f32.mrf.mxu2 }
 0x1dd   :  { %v2960_v17 = vadd.f32 %v669_v16, %v2902_v38 }
 0x1df   :  { %v1037_v18 = vsel %vm53_vm0, %v2960_v17, -inf }
 0x1e0   :  { %1038 = vmax.xlane.f32.xlu2 %v1037_v18 }
 0x1e5   :  { %v712_v50 = vpop.f32.mrf.mxu3 }
 0x1e6   :  { %v755_v20 = vpop.f32.mrf.mxu1 }
 0x1e7   :  { %v2974_v26 = vadd.f32 %v755_v20, %v2902_v38 }
 0x1e9   :  { %v1043_v31 = vsel %vm53_vm0, %v2974_v26, -inf }
 0x1ea   :  { %1044 = vmax.xlane.f32.xlu1 %v1043_v31 }
 0x1ed   :  { %257 = vrot.lane.b32.xlu0 %v2467_v3, %s2409_s16 }
 0x1f4   :  { %v798_v33 = vpop.f32.mrf.mxu2 }
 0x1f5   :  { %v2984_v35 = vadd.f32 %v798_v33, %v2902_v38 }
 0x1f7   :  { %v1046_v39 = vsel %vm53_vm0, %v2984_v35, -inf }
 0x1f8   :  { %1047 = vmax.xlane.f32.xlu2 %v1046_v39 }
 0x1fd   :  { %v1018_v43 = vpop.xlane.xlu2 %1017 }
 0x1fe   :  { %v1064_v44 = vsub.f32 %v2908_v25, %v1018_v43  ;;  %v3001_v25 = vadd.f32 %v712_v50, %v2902_v38 }
 0x200   :  { %v1080_v45 = vmul.f32 1.442695, %v1064_v44  ;;  %v1040_v34 = vsel %vm53_vm0, %v3001_v25, -inf }
 0x202   :  { %2343 = vpow2.f32 %v1080_v45 }
 0x205   :  { %v841_v41 = vpop.f32.mrf.mxu3 }
 0x206   :  { %v3007_v58 = vadd.f32 %v841_v41, %v2902_v38 }
 0x208   :  { %v2989_v46 = vpop.eup %2343 }
 0x209   :  { %2122 = vmatmul.msk.f32.vlgmr.msra.gmra.mxu2 %vm53_vm0, %v2989_v46 }
 0x20b   :  { %v884_v48 = vpop.f32.mrf.mxu1 }
 0x20c   :  { %v2994_v3 = vadd.f32 %v884_v48, %v2902_v38 }
 0x20e   :  { %v1052_v24 = vsel %vm53_vm0, %v2994_v3, -inf }
 0x20f   :  { %1053 = vmax.xlane.f32.xlu1 %v1052_v24 }
 0x210   :  { %253 = vrot.lane.b32.xlu2 %v2472_v4, %s2409_s16  ;;  %v1049_v4 = vsel %vm53_vm0, %v3007_v58, -inf }
 0x213   :  { %v1021_v51 = vpop.xlane.xlu0 %1020 }
 0x214   :  { %v1065_v52 = vsub.f32 %v2926_v57, %v1021_v51  ;;  %v927_v54 = vpop.f32.mrf.mxu2 }
 0x215   :  { %v3026_v11 = vadd.f32 %v927_v54, %v2902_v38 }
 0x216   :  { %v1082_v53 = vmul.f32 1.442695, %v1065_v52 }
 0x217   :  { %1041 = vmax.xlane.f32.xlu0 %v1040_v34 }
 0x218   :  { %2345 = vpow2.f32 %v1082_v53 }
 0x21e   :  { %v3009_v59 = vpop.eup %2345 }
 0x21f   :  { %1050 = vmax.xlane.f32.xlu0 %v1049_v4  ;;  %2123 = vmatmul.msk.f32.gmra.mxu2 %vm53_vm0, %v3009_v59 }
 0x223   :  { %v1013_v33 = vpop.f32.mrf.mxu1 }
 0x224   :  { %v1024_v57 = vpop.xlane.xlu1 %1023 }
 0x225   :  { %v1066_v0 = vsub.f32 %v2935_v61, %v1024_v57 }
 0x227   :  { %v1084_v27 = vmul.f32 1.442695, %v1066_v0 }
 0x228   :  { %255 = vrot.lane.b32.xlu1 %v2494_v9, %s2409_s16  ;;  %v1055_v9 = vsel %vm53_vm0, %v3026_v11, -inf }
 0x229   :  { %2347 = vpow2.f32 %v1084_v27 }
 0x22f   :  { %v3018_v5 = vpop.eup %2347 }
 0x230   :  { %2124 = vmatmul.msk.f32.gmra.mxu2 %vm53_vm0, %v3018_v5 }
 0x232   :  { %v1027_v63 = vpop.xlane.xlu2 %1026 }
 0x233   :  { %v1067_v6 = vsub.f32 %v2940_v2, %v1027_v63  ;;  %251 = vrot.lane.b32.xlu0 %v2499_v10, %s2409_s16  ;;  %v970_v10 = vpop.f32.mrf.mxu3 }
 0x234   :  { %v3036_v19 = vadd.f32 %v970_v10, %v2902_v38 }
 0x235   :  { %v1086_v61 = vmul.f32 1.442695, %v1067_v6 }
 0x237   :  { %2349 = vpow2.f32 %v1086_v61 }
 0x239   :  { %1056 = vmax.xlane.f32.xlu2 %v1055_v9 }
 0x23d   :  { %v3030_v12 = vpop.eup %2349 }
 0x23e   :  { %3585 = vst [vmem:[#allocation2_spill] sm:$0xff] %v3030_v12  ;;  %2125 = vmatmul.msk.f32.gmra.mxu2 %vm53_vm0, %v3030_v12 }
 0x242   :  { %v1036_v23 = vpop.xlane.xlu1 %1035 }
 0x243   :  { %v1030_v15 = vpop.xlane.xlu2 %1029  ;;  %v1070_v31 = vsub.f32 %v2945_v56, %v1036_v23 }
 0x244   :  { %v1068_v2 = vsub.f32 %v2950_v7, %v1030_v15  ;;  %v1058_v7 = vsel %vm53_vm0, %v3036_v19, -inf }
 0x245   :  { %v1092_v39 = vmul.f32 1.442695, %v1070_v31 }
 0x246   :  { %v1088_v16 = vmul.f32 1.442695, %v1068_v2 }
 0x248   :  { %2351 = vpow2.f32 %v1088_v16 }
 0x24c   :  { %v1033_v18 = vpop.xlane.xlu0 %1032 }
 0x24d   :  { %v1069_v20 = vsub.f32 %v2955_v13, %v1033_v18  ;;  %v3049_v13 = vadd.f32 %v1013_v33, %v2902_v38 }
 0x24e   :  { %v3039_v22 = vpop.eup %2351 }
 0x24f   :  { %3586 = vst [vmem:[#allocation3_spill] sm:$0xff] %v3039_v22  ;;  %v1090_v29 = vmul.f32 1.442695, %v1069_v20  ;;  %2126 = vmatmul.msk.f32.gmra.mxu2 %vm53_vm0, %v3039_v22  ;;  %v1061_v56 = vsel %vm53_vm0, %v3049_v13, -inf }
 0x251   :  { %2353 = vpow2.f32 %v1090_v29 }
 0x252   :  { %1059 = vmax.xlane.f32.xlu1 %v1058_v7  ;;  %2355 = vpow2.f32 %v1092_v39 }
 0x253   :  { %v1039_v43 = vpop.xlane.xlu2 %1038 }
 0x254   :  { %v1071_v45 = vsub.f32 %v2960_v17, %v1039_v43 }
 0x256   :  { %v1094_v48 = vmul.f32 1.442695, %v1071_v45 }
 0x257   :  { %v3046_v44 = vpop.eup %2353 }
 0x258   :  { %3587 = vst [vmem:[#allocation4_spill] sm:$0xff] %v3046_v44  ;;  %2127 = vmatmul.msk.f32.gmra.mxu2 %vm53_vm0, %v3046_v44  ;;  %v3056_v24 = vpop.eup %2355  ;;  %2357 = vpow2.f32 %v1094_v48 }
 0x259   :  { %3588 = vst [vmem:[#allocation5_spill] sm:$0xff] %v3056_v24 }
 0x25d   :  { %1062 = vmax.xlane.f32.xlu0 %v1061_v56  ;;  %v1045_v20 = vpop.xlane.xlu1 %1044 }
 0x25e   :  { %v3060_v50 = vpop.eup %2357  ;;  %v1073_v7 = vsub.f32 %v2974_v26, %v1045_v20 }
 0x25f   :  { %3589 = vst [vmem:[#allocation6_spill] sm:$0xff] %v3060_v50  ;;  %v3064_v51 = vpop.permute.xlu0 %257 }
 0x260   :  { %2128 = vmatmul.msk.f32.gmra.mxu2 %vm53_vm0, %v3056_v24  ;;  %v278_v53 = vmul.f32 %v3064_v51, %v2641_v60  ;;  %v3078_v41 = vmul.f32 %v3064_v51, %v2596_v42  ;;  %v3086_v57 = vmul.f32 %v3064_v51, %v2695_v21  ;;  %v3094_v27 = vmul.f32 %v3064_v51, %v2759_v62 }
 0x261   :  { %v3100_v6 = vmul.f32 %v3064_v51, %v2808_v37  ;;  %v3104_v61 = vmul.f32 %v3064_v51, %v2665_v8  ;;  %v1098_v39 = vmul.f32 1.442695, %v1073_v7  ;;  %v266_v26 = vmul.f32 %v3064_v51, %v2565_v28 }
 0x268   :  { %2129 = vmatmul.msk.f32.gmra.mxu2 %vm53_vm0, %v3060_v50 }
 0x26b   :  { %v1048_v38 = vpop.xlane.xlu2 %1047 }
 0x26c   :  { %v1074_v45 = vsub.f32 %v2984_v35, %v1048_v38  ;;  %v3148_v38 = vmul.f32 %v3064_v51, %v2780_v14 }
 0x26e   :  { %v1100_v48 = vmul.f32 1.442695, %v1074_v45 }
 0x273   :  { %v3066_v17 = vpop.permute.xlu2 %253 }
 0x274   :  { %v272_v52 = vmul.f32 %v3066_v17, %v2608_v47  ;;  %v3074_v34 = vmul.f32 %v3066_v17, %v2568_v30  ;;  %v3082_v4 = vmul.f32 %v3066_v17, %v2629_v55  ;;  %v3090_v0 = vmul.f32 %v3066_v17, %v2732_v49 }
 0x275   :  { %v3112_v2 = vmul.f32 %v3066_v17, %v2780_v14  ;;  %v3116_v16 = vmul.f32 %v3066_v17, %v2653_v1  ;;  %v3191_v15 = vmul.f32 %v3066_v17, %v2707_v32 }
 0x276   :  { %v2206_v54 = vpack.i.bf16 %v272_v52, %v278_v53 }
 0x278   :  { %2207 = vrot.lane.b32.xlu1 %v2206_v54, %s2409_s16 }
 0x282   :  { %v1054_v33 = vpop.xlane.xlu1 %1053 }
 0x283   :  { %v1076_v45 = vsub.f32 %v2994_v3, %v1054_v33 }
 0x28a   :  { %v1042_v23 = vpop.xlane.xlu0 %1041 }
 0x28b   :  { %v1072_v29 = vsub.f32 %v3001_v25, %v1042_v23 }
 0x28d   :  { %v1096_v31 = vmul.f32 1.442695, %v1072_v29  ;;  %v3156_v29 = vmul.f32 %v3064_v51, %v2568_v30 }
 0x28f   :  { %2359 = vpow2.f32 %v1096_v31  ;;  %v3187_v31 = vmul.f32 %v3066_v17, %v2596_v42 }
 0x290   :  { %2361 = vpow2.f32 %v1098_v39 }
 0x291   :  { %2363 = vpow2.f32 %v1100_v48 }
 0x292   :  { %v1051_v52 = vpop.xlane.xlu0 %1050 }
 0x293   :  { %v1075_v20 = vsub.f32 %v3007_v58, %v1051_v52 }
 0x295   :  { %v3125_v43 = vpop.eup %2359  ;;  %v1102_v7 = vmul.f32 1.442695, %v1075_v20  ;;  %v3183_v20 = vmul.f32 %v3066_v17, %v2808_v37 }
 0x296   :  { %3590 = vst [vmem:[#allocation7_spill] sm:$0xff] %v3125_v43  ;;  %2130 = vmatmul.msk.f32.gmra.mxu2 %vm53_vm0, %v3125_v43  ;;  %v3136_v53 = vpop.eup %2361 }
 0x297   :  { %3591 = vst [vmem:[#allocation8_spill] sm:$0xff] %v3136_v53  ;;  %v3162_v39 = vpop.eup %2363  ;;  %2365 = vpow2.f32 %v1102_v7 }
 0x298   :  { %3592 = vst [vmem:[#allocation9_spill] sm:$0xff] %v3162_v39 }
 0x29a   :  { %v3130_v56 = vpop.permute.xlu1 %255 }
 0x29b   :  { %v265_v25 = vmul.f32 %v3130_v56, %v2565_v28  ;;  %v3144_v35 = vmul.f32 %v3130_v56, %v2780_v14  ;;  %v3152_v23 = vmul.f32 %v3130_v56, %v2568_v30  ;;  %v285_v9 = vmul.f32 %v3130_v56, %v2665_v8 }
 0x29c   :  { %v3201_v7 = vmul.f32 %v3130_v56, %v2759_v62  ;;  %v269_v43 = vmul.f32 %v3130_v56, %v2582_v36 }
 0x29d   :  { %v2181_v54 = vpack.i.bf16 %v265_v25, %v266_v26  ;;  %v284_v25 = vmul.f32 %v3066_v17, %v2665_v8  ;;  %v264_v26 = vmul.f32 %v3066_v17, %v2565_v28 }
 0x29e   :  { %2131 = vmatmul.msk.f32.gmra.mxu2 %vm53_vm0, %v3136_v53  ;;  %v3248_v53 = vpop.eup %2365 }
 0x29f   :  { %2182 = vrot.lane.b32.xlu2 %v2181_v54, %s2409_s16  ;;  %v277_v54 = vmul.f32 %v3130_v56, %v2641_v60  ;;  %3593 = vst [vmem:[#allocation10_spill] sm:$0xff] %v3248_v53 }
 0x2a5   :  { %v3165_v48 = vpop.permute.xlu0 %251 }
 0x2a6   :  { %2132 = vmatmul.msk.f32.gmra.mxu2 %vm53_vm0, %v3162_v39  ;;  %v271_v52 = vmul.f32 %v3165_v48, %v2608_v47  ;;  %v283_v3 = vmul.f32 %v3165_v48, %v2665_v8  ;;  %v263_v33 = vmul.f32 %v3165_v48, %v2565_v28  ;;  %v3197_v28 = vmul.f32 %v3130_v56, %v2695_v21 }
 0x2a7   :  { %v279_v8 = vmul.f32 %v3165_v48, %v2653_v1  ;;  %v3242_v63 = vmul.f32 %v3165_v48, %v2720_v40  ;;  %v3246_v39 = vmul.f32 %v3165_v48, %v2780_v14  ;;  %v293_v14 = vmul.f32 %v3130_v56, %v2596_v42 }
 0x2a8   :  { %v2211_v58 = vpack.i.bf16 %v271_v52, %v277_v54  ;;  %v2236_v18 = vpack.i.bf16 %v283_v3, %v284_v25  ;;  %v2186_v10 = vpack.i.bf16 %v263_v33, %v264_v26  ;;  %v3205_v52 = vmul.f32 %v3066_v17, %v2720_v40 }
 0x2a9   :  { %v1104_v25 = vmul.f32 1.442695, %v1076_v45  ;;  %v3213_v26 = vmul.f32 %v3165_v48, %v2808_v37  ;;  %v3217_v54 = vmul.f32 %v3130_v56, %v2808_v37  ;;  %v3222_v45 = vmul.f32 %v3165_v48, %v2596_v42 }
 0x2aa   :  { %2212 = vrot.lane.b32.xlu0 %v2211_v58, %s2409_s16  ;;  %2237 = vrot.lane.b32.xlu1 %v2236_v18, %s2409_s16  ;;  %v3226_v18 = vmul.f32 %v3165_v48, %v2629_v55  ;;  %v3230_v58 = vmul.f32 %v3165_v48, %v2707_v32  ;;  %v3234_v3 = vmul.f32 %v3165_v48, %v2732_v49 }
 0x2ab   :  { %2187 = vrot.lane.b32.xlu2 %v2186_v10, %s2409_s16  ;;  %v287_v10 = vmul.f32 %v3165_v48, %v2568_v30  ;;  %v2331_v50 = vpack.i.bf16 %v3246_v39, %v3217_v54  ;;  %2367 = vpow2.f32 %v1104_v25  ;;  %v270_v33 = vmul.f32 %v3064_v51, %v2582_v36 }
 0x2ac   :  { %v1057_v37 = vpop.xlane.xlu2 %1056  ;;  %v2301_v24 = vpack.i.bf16 %v3234_v3, %v3201_v7  ;;  %v2231_v22 = vpack.i.bf16 %v279_v8, %v285_v9  ;;  %v267_v25 = vmul.f32 %v3165_v48, %v2582_v36  ;;  %v273_v8 = vmul.f32 %v3130_v56, %v2608_v47 }
 0x2ad   :  { %v1077_v30 = vsub.f32 %v3026_v11, %v1057_v37  ;;  %v2191_v12 = vpack.i.bf16 %v269_v43, %v270_v33  ;;  %v268_v11 = vmul.f32 %v3066_v17, %v2582_v36  ;;  %v297_v43 = vmul.f32 %v3130_v56, %v2629_v55 }
 0x2ae   :  { %2133 = vmatmul.msk.f32.gmra.mxu2 %vm53_vm0, %v3248_v53  ;;  %v2251_v53 = vpack.i.bf16 %v287_v10, %v293_v14  ;;  %v299_v33 = vmul.f32 %v3165_v48, %v2695_v21  ;;  %v276_v14 = vmul.f32 %v3066_v17, %v2641_v60 }
 0x2af   :  { %v1106_v42 = vmul.f32 1.442695, %v1077_v30  ;;  %v2196_v9 = vpack.i.bf16 %v267_v25, %v268_v11 }
 0x2b1   :  { %v3274_v44 = vpop.eup %2367  ;;  %2369 = vpow2.f32 %v1106_v42 }
 0x2b2   :  { %2232 = vrot.lane.b32.xlu0 %v2231_v22, %s2409_s16  ;;  %2252 = vrot.lane.b32.xlu1 %v2251_v53, %s2409_s16  ;;  %v3594_v22 = vpack.i.bf16 %v3074_v34, %v3078_v41  ;;  %v305_v53 = vmul.f32 %v3130_v56, %v2707_v32  ;;  %v298_v34 = vmul.f32 %v3064_v51, %v2629_v55 }
 0x2b3   :  { %2192 = vrot.lane.b32.xlu2 %v2191_v12, %s2409_s16  ;;  %v3595_v12 = vpack.i.bf16 %v3082_v4, %v3086_v57  ;;  %v306_v41 = vmul.f32 %v3064_v51, %v2707_v32  ;;  %v274_v4 = vmul.f32 %v3064_v51, %v2608_v47  ;;  %v275_v55 = vmul.f32 %v3165_v48, %v2641_v60 }
 0x2b4   :  { %v2261_v57 = vpack.i.bf16 %v297_v43, %v298_v34  ;;  %v300_v47 = vmul.f32 %v3066_v17, %v2695_v21  ;;  %v317_v21 = vmul.f32 %v3130_v56, %v2720_v40  ;;  %v281_v60 = vmul.f32 %v3130_v56, %v2653_v1 }
 0x2b5   :  { %v2281_v37 = vpack.i.bf16 %v305_v53, %v306_v41  ;;  %v2201_v10 = vpack.i.bf16 %v273_v8, %v274_v4  ;;  %v2216_v11 = vpack.i.bf16 %v275_v55, %v276_v14  ;;  %v3598_v4 = vpack.i.bf16 %v3116_v16, %v3104_v61 }
 0x2b6   :  { %2134 = vmatmul.msk.f32.gmra.mxu2 %vm53_vm0, %v3274_v44  ;;  %v2276_v25 = vpack.i.bf16 %v299_v33, %v300_v47  ;;  %v3601_v61 = vpack.i.bf16 %v3213_v26, %v3183_v20 }
 0x2b7   :  { %v3295_v36 = vpop.eup %2369 }
 0x2ba   :  { %2247 = vrot.lane.b32.xlu0 %v3594_v22, %s2409_s16  ;;  %2267 = vrot.lane.b32.xlu1 %v3595_v12, %s2409_s16  ;;  %v310_v22 = vmul.f32 %v3064_v51, %v2732_v49  ;;  %v318_v12 = vmul.f32 %v3064_v51, %v2720_v40  ;;  %v312_v40 = vmul.f32 %v3066_v17, %v2759_v62 }
 0x2bb   :  { %2197 = vrot.lane.b32.xlu2 %v2196_v9, %s2409_s16  ;;  %v3596_v9 = vpack.i.bf16 %v3090_v0, %v3094_v27  ;;  %v282_v0 = vmul.f32 %v3064_v51, %v2653_v1  ;;  %v311_v1 = vmul.f32 %v3165_v48, %v2759_v62  ;;  %v1181_v48 = vpop.f32.mrf.mxu2  ;;  %v3599_v62 = vpack.i.bf16 %v3144_v35, %v3148_v38 }
 0x2bc   :  { %v2311_v8 = vpack.i.bf16 %v317_v21, %v318_v12  ;;  %v3600_v17 = vpack.i.bf16 %v3152_v23, %v3156_v29  ;;  %v3603_v35 = vpack.i.bf16 %v3226_v18, %v3197_v28 }
 0x2bd   :  { %v2306_v51 = vpack.i.bf16 %v311_v1, %v312_v40 }
 0x2be   :  { %2135 = vmatmul.msk.f32.gmra.mxu2 %vm53_vm0, %v3295_v36 }
 0x2c2   :  { %2262 = vrot.lane.b32.xlu0 %v2261_v57, %s2409_s16  ;;  %2282 = vrot.lane.b32.xlu1 %v2281_v37, %s2409_s16  ;;  %v3604_v57 = vpack.i.bf16 %v3230_v58, %v3191_v15  ;;  %v3605_v58 = vpack.i.bf16 %v3242_v63, %v3205_v52 }
 0x2c3   :  { %2202 = vrot.lane.b32.xlu2 %v2201_v10, %s2409_s16 }
 0x2c5   :  { %v1060_v30 = vpop.xlane.xlu1 %1059 }
 0x2c6   :  { %v1078_v32 = vsub.f32 %v3036_v19, %v1060_v30  ;;  %v309_v19 = vmul.f32 %v3130_v56, %v2732_v49  ;;  %v2221_v56 = vpack.i.bf16 %v281_v60, %v282_v0 }
 0x2c8   :  { %v1108_v42 = vmul.f32 1.442695, %v1078_v32  ;;  %v2291_v53 = vpack.i.bf16 %v309_v19, %v310_v22 }
 0x2ca   :  { %2371 = vpow2.f32 %v1108_v42  ;;  %2277 = vrot.lane.b32.xlu0 %v2276_v25, %s2409_s16  ;;  %2297 = vrot.lane.b32.xlu1 %v3596_v9, %s2409_s16 }
 0x2cb   :  { %2217 = vrot.lane.b32.xlu2 %v2216_v11, %s2409_s16 }
 0x2d0   :  { %v3337_v27 = vpop.eup %2371  ;;  %v1063_v43 = vpop.xlane.xlu0 %1062 }
 0x2d1   :  { %v1079_v34 = vsub.f32 %v3049_v13, %v1063_v43  ;;  %2136 = vmatmul.msk.f32.gmra.mxu2 %vm53_vm0, %v3337_v27  ;;  %v3597_v13 = vpack.i.bf16 %v3112_v2, %v3100_v6  ;;  %v1184_v6 = vpop.f32.mrf.mxu2  ;;  %v3602_v2 = vpack.i.bf16 %v3222_v45, %v3187_v31 }
 0x2d2   :  { %2292 = vrot.lane.b32.xlu0 %v2291_v53, %s2409_s16  ;;  %2312 = vrot.lane.b32.xlu1 %v2311_v8, %s2409_s16  ;;  %v3606_v8 = vld [vmem:[#allocation2_spill] sm:$0xff] }
 0x2d3   :  { %v1110_v49 = vmul.f32 1.442695, %v1079_v34  ;;  %2222 = vrot.lane.b32.xlu2 %v2221_v56, %s2409_s16 }
 0x2d5   :  { %2373 = vpow2.f32 %v1110_v49 }
 0x2d6   :  { %2375 = vrcp.f32 %v1181_v48 }
 0x2d7   :  { %2377 = vrcp.f32 %v1184_v6 }
 0x2d9   :  { %v1187_v16 = vpop.f32.mrf.mxu2 }
 0x2da   :  { %2307 = vrot.lane.b32.xlu0 %v2306_v51, %s2409_s16  ;;  %2327 = vrot.lane.b32.xlu1 %v3597_v13, %s2409_s16  ;;  %2379 = vrcp.f32 %v1187_v16  ;;  %v3607_v16 = vld [vmem:[#allocation3_spill] sm:$0xff] }
 0x2db   :  { %v3354_v41 = vpop.eup %2373  ;;  %2227 = vrot.lane.b32.xlu2 %v3598_v4, %s2409_s16 }
 0x2dc   :  { %2137 = vmatmul.msk.f32.gmra.mxu2 %vm53_vm0, %v3354_v41  ;;  %v2376_v28 = vpop.eup %2375 }
 0x2dd   :  { %v1245_v37 = vmul.f32 %v2376_v28, %v2989_v46  ;;  %v2378_v30 = vpop.eup %2377 }
 0x2de   :  { %v1246_v55 = vmul.f32 %v2378_v30, %v3009_v59 }
 0x2e0   :  { %v2380_v11 = vpop.eup %2379 }
 0x2e1   :  { %v1190_v38 = vpop.f32.mrf.mxu2  ;;  %v1247_v60 = vmul.f32 %v2380_v11, %v3018_v5 }
 0x2e2   :  { %2322 = vrot.lane.b32.xlu0 %v3599_v62, %s2409_s16  ;;  %2381 = vrcp.f32 %v1190_v38 }
 0x2e3   :  { %2242 = vrot.lane.b32.xlu2 %v3600_v17, %s2409_s16 }
 0x2e8   :  { %v2382_v0 = vpop.eup %2381 }
 0x2e9   :  { %v3386_v26 = vpop.f32.mrf.mxu2  ;;  %v1248_v34 = vmul.f32 %v2382_v0, %v3606_v8 }
 0x2ea   :  { %2337 = vrot.lane.b32.xlu0 %v3601_v61, %s2409_s16  ;;  %v2208_v46 = vpop.permute.xlu1 %2207  ;;  %2383 = vrcp.f32 %v3386_v26  ;;  %v3608_v26 = vld [vmem:[#allocation4_spill] sm:$0xff] }
 0x2eb   :  { %2257 = vrot.lane.b32.xlu2 %v3602_v2, %s2409_s16  ;;  %v2209_v32 = vunpack.i.l.bf16 %v2208_v46  ;;  %v2210_v59 = vunpack.i.h.bf16 %v2208_v46 }
 0x2f0   :  { %v2384_v62 = vpop.eup %2383 }
 0x2f1   :  { %v1196_v15 = vpop.f32.mrf.mxu2 }
 0x2f2   :  { %2385 = vrcp.f32 %v1196_v15 }
 0x2f3   :  { %2272 = vrot.lane.b32.xlu2 %v3603_v35, %s2409_s16  ;;  %v1249_v35 = vmul.f32 %v2384_v62, %v3607_v16 }
 0x2f9   :  { %v2183_v23 = vpop.permute.xlu2 %2182  ;;  %v3398_v7 = vpop.f32.mrf.mxu2 }
 0x2fa   :  { %v2184_v29 = vunpack.i.l.bf16 %v2183_v23  ;;  %v2185_v20 = vunpack.i.h.bf16 %v2183_v23  ;;  %v2386_v23 = vpop.eup %2385  ;;  %2387 = vrcp.f32 %v3398_v7 }
 0x2fb   :  { %2287 = vrot.lane.b32.xlu2 %v3604_v57, %s2409_s16 }
 0x2fc   :  { %1292 = vmatpush.msrb.mxu3 %v2184_v29 }
 0x2fe   :  { %1293 = vmatpush.msrb.mxu3 %v2185_v20 }
 0x301   :  { %v3408_v42 = vpop.f32.mrf.mxu2 }
 0x302   :  { %2389 = vrcp.f32 %v3408_v42 }
 0x303   :  { %2302 = vrot.lane.b32.xlu2 %v2301_v24, %s2409_s16 }
 0x305   :  { %v2188_v31 = vpop.permute.xlu2 %2187 }
 0x306   :  { %v2189_v45 = vunpack.i.l.bf16 %v2188_v31  ;;  %v2190_v18 = vunpack.i.h.bf16 %v2188_v31  ;;  %v1250_v31 = vmul.f32 %v2386_v23, %v3608_v26  ;;  %v3614_v26 = vld [vmem:[#allocation10_spill] sm:$0xff] }
 0x308   :  { %1294 = vmatpush.msrb.mxu3 %v2189_v45 }
 0x30a   :  { %1295 = vmatpush.msrb.mxu3 %v2190_v18 }
 0x30b   :  { %2317 = vrot.lane.b32.xlu2 %v3605_v58, %s2409_s16  ;;  %2138 = vmatmul.msk.f32.vlgmr.msrb.gmra.mxu3 %vm53_vm0, %v1245_v37 }
 0x30d   :  { %v2193_v10 = vpop.permute.xlu2 %2192 }
 0x30e   :  { %v2194_v33 = vunpack.i.l.bf16 %v2193_v10  ;;  %v2195_v24 = vunpack.i.h.bf16 %v2193_v10  ;;  %v2388_v10 = vpop.eup %2387 }
 0x310   :  { %1331 = vmatpush.msra.mxu3 %v2194_v33 }
 0x312   :  { %1332 = vmatpush.msra.mxu3 %v2195_v24 }
 0x313   :  { %2332 = vrot.lane.b32.xlu2 %v2331_v50, %s2409_s16 }
 0x315   :  { %v2198_v3 = vpop.permute.xlu2 %2197 }
 0x316   :  { %v2199_v63 = vunpack.i.l.bf16 %v2198_v3  ;;  %v2200_v52 = vunpack.i.h.bf16 %v2198_v3  ;;  %v3609_v3 = vld [vmem:[#allocation5_spill] sm:$0xff] }
 0x317   :  { %v1251_v30 = vmul.f32 %v2388_v10, %v3609_v3 }
 0x318   :  { %1333 = vmatpush.msra.mxu3 %v2199_v63 }
 0x319   :  { %v3413_v22 = vpop.f32.mrf.mxu2 }
 0x31a   :  { %1334 = vmatpush.msra.mxu3 %v2200_v52  ;;  %2391 = vrcp.f32 %v3413_v22 }
 0x31b   :  { %2139 = vmatmul.msk.f32.vlgmr.msra.gmra.mxu3 %vm53_vm0, %v1246_v55  ;;  %v2390_v55 = vpop.eup %2389 }
 0x31c   :  { %1409 = vmatpush.msrb.mxu3 %v2209_v32  ;;  %v2213_v47 = vpop.permute.xlu0 %2212  ;;  %v3406_v14 = vpop.permute.xlu1 %2237 }
 0x31d   :  { %v2214_v50 = vunpack.i.l.bf16 %v2213_v47  ;;  %v2203_v39 = vpop.permute.xlu2 %2202  ;;  %v2215_v9 = vunpack.i.h.bf16 %v2213_v47  ;;  %v2239_v29 = vunpack.i.l.bf16 %v3406_v14  ;;  %v2240_v57 = vunpack.i.h.bf16 %v3406_v14 }
 0x31e   :  { %v2204_v54 = vunpack.i.l.bf16 %v2203_v39  ;;  %v2205_v25 = vunpack.i.h.bf16 %v2203_v39  ;;  %v3610_v39 = vld [vmem:[#allocation6_spill] sm:$0xff] }
 0x31f   :  { %1410 = vmatpush.msrb.mxu3 %v2214_v50 }
 0x320   :  { %1370 = vmatpush.msrb.mxu1 %v2204_v54  ;;  %v1252_v54 = vmul.f32 %v2390_v55, %v3610_v39  ;;  %v1887_v55 = vld [vmem:[%s3573_s3 + $0x10] sm:$0xff] }
 0x321   :  { %v3420_v40 = vpop.f32.mrf.mxu2 }
 0x322   :  { %1371 = vmatpush.msrb.mxu1 %v2205_v25  ;;  %2393 = vrcp.f32 %v3420_v40 }
 0x324   :  { %1372 = vmatpush.msrb.mxu1 %v2210_v59  ;;  %v2233_v19 = vpop.permute.xlu0 %2232  ;;  %v3410_v21 = vpop.permute.xlu1 %2252 }
 0x325   :  { %v2218_v12 = vpop.permute.xlu2 %2217  ;;  %v2235_v61 = vunpack.i.h.bf16 %v2233_v19  ;;  %v2234_v2 = vunpack.i.l.bf16 %v2233_v19  ;;  %v2254_v15 = vunpack.i.l.bf16 %v3410_v21  ;;  %v2255_v7 = vunpack.i.h.bf16 %v3410_v21 }
 0x326   :  { %v2219_v43 = vunpack.i.l.bf16 %v2218_v12  ;;  %1373 = vmatpush.msrb.mxu1 %v2215_v9  ;;  %v2220_v53 = vunpack.i.h.bf16 %v2218_v12  ;;  %v2392_v9 = vpop.eup %2391  ;;  %v3611_v12 = vld [vmem:[#allocation7_spill] sm:$0xff] }
 0x327   :  { %2140 = vmatmul.msk.f32.vlgmr.msrb.gmra.mxu1 %vm53_vm0, %v1247_v60  ;;  %v1253_v0 = vmul.f32 %v2392_v9, %v3611_v12 }
 0x328   :  { %1411 = vmatpush.msrb.mxu3 %v2219_v43  ;;  %v2394_v43 = vpop.eup %2393 }
 0x329   :  { %v3426_v38 = vpop.f32.mrf.mxu2 }
 0x32a   :  { %1412 = vmatpush.msrb.mxu3 %v2220_v53  ;;  %2395 = vrcp.f32 %v3426_v38 }
 0x32b   :  { %2141 = vmatmul.msk.f32.vlgmr.msrb.gmra.mxu3 %vm53_vm0, %v1248_v34 }
 0x32c   :  { %v2248_v56 = vpop.permute.xlu0 %2247  ;;  %v3418_v49 = vpop.permute.xlu1 %2267 }
 0x32d   :  { %v2223_v1 = vpop.permute.xlu2 %2222  ;;  %v2249_v45 = vunpack.i.l.bf16 %v2248_v56  ;;  %v2250_v33 = vunpack.i.h.bf16 %v2248_v56  ;;  %v2270_v11 = vunpack.i.h.bf16 %v3418_v49  ;;  %v2269_v59 = vunpack.i.l.bf16 %v3418_v49  ;;  %v3612_v49 = vld [vmem:[#allocation8_spill] sm:$0xff] }
 0x32e   :  { %v2224_v5 = vunpack.i.l.bf16 %v2223_v1  ;;  %v2225_v51 = vunpack.i.h.bf16 %v2223_v1  ;;  %v1254_v1 = vmul.f32 %v2394_v43, %v3612_v49 }
 0x330   :  { %1448 = vmatpush.msra.mxu1 %v2224_v5 }
 0x331   :  { %v1214_v24 = vpop.f32.mrf.mxu2 }
 0x332   :  { %1449 = vmatpush.msra.mxu1 %v2225_v51  ;;  %2397 = vrcp.f32 %v1214_v24 }
 0x334   :  { %v3423_v13 = vpop.permute.xlu1 %2282  ;;  %v2263_v4 = vpop.permute.xlu0 %2262 }
 0x335   :  { %v2228_v48 = vpop.permute.xlu2 %2227  ;;  %v2264_v32 = vunpack.i.l.bf16 %v2263_v4  ;;  %v2265_v42 = vunpack.i.h.bf16 %v2263_v4  ;;  %v2284_v40 = vunpack.i.l.bf16 %v3423_v13 }
 0x336   :  { %v2230_v17 = vunpack.i.h.bf16 %v2228_v48  ;;  %v2229_v6 = vunpack.i.l.bf16 %v2228_v48  ;;  %v2285_v48 = vunpack.i.h.bf16 %v3423_v13 }
 0x338   :  { %1450 = vmatpush.msra.mxu1 %v2230_v17  ;;  %1487 = vmatpush.msra.mxu3 %v2229_v6  ;;  %v2396_v6 = vpop.eup %2395 }
 0x339   :  { %v1217_v19 = vpop.f32.mrf.mxu2  ;;  %v2398_v16 = vpop.eup %2397 }
 0x33a   :  { %1451 = vmatpush.msra.mxu1 %v2235_v61  ;;  %1488 = vmatpush.msra.mxu3 %v2234_v2  ;;  %2399 = vrcp.f32 %v1217_v19 }
 0x33b   :  { %2142 = vmatmul.msk.f32.vlgmr.msra.gmra.mxu1 %vm53_vm0, %v1249_v35  ;;  %v3613_v35 = vld [vmem:[#allocation9_spill] sm:$0xff] }
 0x33c   :  { %1489 = vmatpush.msra.mxu3 %v2239_v29  ;;  %v3432_v20 = vpop.permute.xlu1 %2297  ;;  %v3435_v37 = vpop.permute.xlu0 %2277  ;;  %v1255_v38 = vmul.f32 %v2396_v6, %v3613_v35 }
 0x33d   :  { %v2243_v28 = vpop.permute.xlu2 %2242  ;;  %v2279_v53 = vunpack.i.l.bf16 %v3435_v37  ;;  %v2280_v34 = vunpack.i.h.bf16 %v3435_v37  ;;  %v2300_v51 = vunpack.i.h.bf16 %v3432_v20  ;;  %v2299_v2 = vunpack.i.l.bf16 %v3432_v20 }
 0x33e   :  { %v2244_v18 = vunpack.i.l.bf16 %v2243_v28  ;;  %1490 = vmatpush.msra.mxu3 %v2240_v57  ;;  %v2245_v58 = vunpack.i.h.bf16 %v2243_v28 }
 0x33f   :  { %2143 = vmatmul.msk.f32.vlgmr.msra.gmra.mxu3 %vm53_vm0, %v1250_v31  ;;  %v1256_v31 = vmul.f32 %v2398_v16, %v3614_v26 }
 0x340   :  { %1565 = vmatpush.msrb.mxu3 %v2249_v45  ;;  %1526 = vmatpush.msrb.mxu1 %v2244_v18  ;;  %v2400_v20 = vpop.eup %2399 }
 0x341   :  { %v1220_v17 = vpop.f32.mrf.mxu2 }
 0x342   :  { %1566 = vmatpush.msrb.mxu3 %v2254_v15  ;;  %1527 = vmatpush.msrb.mxu1 %v2245_v58  ;;  %2401 = vrcp.f32 %v1220_v17 }
 0x344   :  { %1528 = vmatpush.msrb.mxu1 %v2250_v33  ;;  %v2313_v46 = vpop.permute.xlu1 %2312  ;;  %v2293_v25 = vpop.permute.xlu0 %2292  ;;  %v1257_v33 = vmul.f32 %v2400_v20, %v3274_v44  ;;  %v1888_v44 = vld [vmem:[%s3573_s3 + $0x18] sm:$0xff] }
 0x345   :  { %v2258_v63 = vpop.permute.xlu2 %2257  ;;  %v2314_v52 = vunpack.i.l.bf16 %v2313_v46  ;;  %v2315_v14 = vunpack.i.h.bf16 %v2313_v46  ;;  %v2294_v8 = vunpack.i.l.bf16 %v2293_v25  ;;  %v2295_v56 = vunpack.i.h.bf16 %v2293_v25 }
 0x346   :  { %v2259_v47 = vunpack.i.l.bf16 %v2258_v63  ;;  %1529 = vmatpush.msrb.mxu1 %v2255_v7  ;;  %v2260_v50 = vunpack.i.h.bf16 %v2258_v63 }
 0x347   :  { %2144 = vmatmul.msk.f32.vlgmr.msrb.gmra.mxu1 %vm53_vm0, %v1251_v30  ;;  %1799 = vmatpush.msrb.mxu0 %v2314_v52 }
 0x348   :  { %1604 = vmatpush.msra.mxu1 %v2264_v32  ;;  %1567 = vmatpush.msrb.mxu3 %v2259_v47  ;;  %v2402_v46 = vpop.eup %2401 }
 0x349   :  { %1800 = vmatpush.msrb.mxu0 %v2315_v14  ;;  %v1258_v52 = vmul.f32 %v2402_v46, %v3295_v36  ;;  %v1886_v36 = vld [vmem:[%s3573_s3 + $0x8] sm:$0xff] }
 0x34a   :  { %1605 = vmatpush.msra.mxu1 %v2265_v42  ;;  %1568 = vmatpush.msrb.mxu3 %v2260_v50 }
 0x34b   :  { %2145 = vmatmul.msk.f32.vlgmr.msrb.gmra.mxu3 %vm53_vm0, %v1252_v54 }
 0x34c   :  { %1606 = vmatpush.msra.mxu1 %v2270_v11  ;;  %1643 = vmatpush.msra.mxu3 %v2269_v59  ;;  %v2308_v5 = vpop.permute.xlu0 %2307  ;;  %v2328_v18 = vpop.permute.xlu1 %2327  ;;  %v1885_v11 = vld [vmem:[%s3573_s3] sm:$0xff] }
 0x34d   :  { %v2273_v21 = vpop.permute.xlu2 %2272  ;;  %v2309_v45 = vunpack.i.l.bf16 %v2308_v5  ;;  %v2310_v15 = vunpack.i.h.bf16 %v2308_v5  ;;  %v2329_v10 = vunpack.i.l.bf16 %v2328_v18  ;;  %v2330_v24 = vunpack.i.h.bf16 %v2328_v18 }
 0x34e   :  { %v2275_v60 = vunpack.i.h.bf16 %v2273_v21  ;;  %v2274_v22 = vunpack.i.l.bf16 %v2273_v21 }
 0x350   :  { %1607 = vmatpush.msra.mxu1 %v2275_v60  ;;  %1644 = vmatpush.msra.mxu3 %v2274_v22 }
 0x351   :  { %2146 = vmatmul.msk.f32.vlgmr.msra.gmra.mxu1 %vm53_vm0, %v1253_v0 }
 0x352   :  { %1721 = vmatpush.msrb.mxu1 %v2294_v8  ;;  %1645 = vmatpush.msra.mxu3 %v2279_v53 }
 0x354   :  { %1722 = vmatpush.msrb.mxu1 %v2295_v56  ;;  %1646 = vmatpush.msra.mxu3 %v2280_v34  ;;  %v2323_v23 = vpop.permute.xlu0 %2322  ;;  %v1223_v28 = vpop.f32.mrf.mxu2 }
 0x355   :  { %v2288_v4 = vpop.permute.xlu2 %2287  ;;  %2147 = vmatmul.msk.f32.vlgmr.msra.gmra.mxu3 %vm53_vm0, %v1254_v1  ;;  %v2324_v37 = vunpack.i.l.bf16 %v2323_v23  ;;  %v2325_v58 = vunpack.i.h.bf16 %v2323_v23  ;;  %2403 = vrcp.f32 %v1223_v28  ;;  %v2342_v1 = vld [vmem:[%s3574_s4] ss:$0 sm:$0xff] }
 0x356   :  { %v2289_v62 = vunpack.i.l.bf16 %v2288_v4  ;;  %1682 = vmatpush.msrb.mxu3 %v2284_v40  ;;  %1723 = vmatpush.msrb.mxu1 %v2300_v51  ;;  %v2290_v61 = vunpack.i.h.bf16 %v2288_v4 }
 0x358   :  { %1683 = vmatpush.msrb.mxu3 %v2285_v48 }
 0x35a   :  { %1684 = vmatpush.msrb.mxu3 %v2289_v62 }
 0x35b   :  { %v2404_v32 = vpop.eup %2403 }
 0x35c   :  { %1685 = vmatpush.msrb.mxu3 %v2290_v61  ;;  %v2338_v47 = vpop.permute.xlu0 %2337  ;;  %v1259_v39 = vmul.f32 %v2404_v32, %v3337_v27 }
 0x35d   :  { %v2303_v29 = vpop.permute.xlu2 %2302  ;;  %2148 = vmatmul.msk.f32.vlgmr.msrb.gmra.mxu3 %vm53_vm0, %v1255_v38  ;;  %v2339_v25 = vunpack.i.l.bf16 %v2338_v47  ;;  %v2340_v59 = vunpack.i.h.bf16 %v2338_v47 }
 0x35e   :  { %1760 = vmatpush.msra.mxu3 %v2299_v2  ;;  %v2305_v57 = vunpack.i.h.bf16 %v2303_v29  ;;  %v2304_v13 = vunpack.i.l.bf16 %v2303_v29 }
 0x35f   :  { %v1226_v30 = vpop.f32.mrf.mxu2 }
 0x360   :  { %1724 = vmatpush.msrb.mxu1 %v2305_v57  ;;  %1761 = vmatpush.msra.mxu3 %v2304_v13  ;;  %2405 = vrcp.f32 %v1226_v30 }
 0x361   :  { %2149 = vmatmul.msk.f32.vlgmr.msrb.gmra.mxu1 %vm53_vm0, %v1256_v31 }
 0x362   :  { %1838 = vmatpush.msra.mxu1 %v2324_v37  ;;  %1762 = vmatpush.msra.mxu3 %v2309_v45 }
 0x364   :  { %1839 = vmatpush.msra.mxu1 %v2325_v58  ;;  %1763 = vmatpush.msra.mxu3 %v2310_v15 }
 0x365   :  { %v2318_v7 = vpop.permute.xlu2 %2317  ;;  %2150 = vmatmul.msk.f32.vlgmr.msra.gmra.mxu3 %vm53_vm0, %v1257_v33 }
 0x366   :  { %1877 = vmatpush.msrb.mxu3 %v2329_v10  ;;  %1840 = vmatpush.msra.mxu1 %v2330_v24  ;;  %v2319_v3 = vunpack.i.l.bf16 %v2318_v7  ;;  %v2320_v63 = vunpack.i.h.bf16 %v2318_v7  ;;  %v2406_v54 = vpop.eup %2405 }
 0x367   :  { %v1260_v9 = vmul.f32 %v2406_v54, %v3354_v41 }
 0x368   :  { %1801 = vmatpush.msrb.mxu0 %v2319_v3 }
 0x36a   :  { %1802 = vmatpush.msrb.mxu0 %v2320_v63 }
 0x36b   :  { %2151 = vmatmul.msk.f32.vlgmr.msrb.gmra.mxu0 %vm53_vm0, %v1258_v52 }
 0x36c   :  { %1953 = vmatpush.msra.mxu0 %v1888_v44 }
 0x36d   :  { %v2333_v14 = vpop.permute.xlu2 %2332 }
 0x36e   :  { %v2335_v42 = vunpack.i.h.bf16 %v2333_v14  ;;  %v2334_v50 = vunpack.i.l.bf16 %v2333_v14  ;;  %1954 = vmatpush.msra.mxu0 %v1887_v55 }
 0x370   :  { %1841 = vmatpush.msra.mxu1 %v2335_v42  ;;  %1878 = vmatpush.msrb.mxu3 %v2334_v50 }
 0x371   :  { %2152 = vmatmul.msk.f32.vlgmr.msra.gmra.mxu1 %vm53_vm0, %v1259_v39  ;;  %1955 = vmatpush.msra.mxu0 %v1886_v36 }
 0x372   :  { %1879 = vmatpush.msrb.mxu3 %v2339_v25 }
 0x373   :  { %1956 = vmatpush.msra.mxu0 %v1885_v11 }
 0x374   :  { %1880 = vmatpush.msrb.mxu3 %v2340_v59 }
 0x375   :  { %2153 = vmatmul.msk.f32.vlgmr.msrb.gmra.mxu3 %vm53_vm0, %v1260_v9 }
 0x38e   :  { %v1297_v27 = vpop.f32.mrf.mxu3 }
 0x38f   :  { %2154 = vmatmul.msk.f32.vlgmr.msra.gmra.mxu0 %vm53_vm0, %v1297_v27 }
 0x39e   :  { %v1336_v19 = vpop.f32.mrf.mxu3 }
 0x39f   :  { %2155 = vmatmul.msk.f32.gmra.mxu0 %vm53_vm0, %v1336_v19 }
 0x3a4   :  { %v1375_v21 = vpop.f32.mrf.mxu1 }
 0x3a7   :  { %2156 = vmatmul.msk.f32.gmra.mxu0 %vm53_vm0, %v1375_v21 }
 0x3ae   :  { %v1414_v60 = vpop.f32.mrf.mxu3 }
 0x3af   :  { %2157 = vmatmul.msk.f32.gmra.mxu0 %vm53_vm0, %v1414_v60 }
 0x3b8   :  { %v1453_v22 = vpop.f32.mrf.mxu1 }
 0x3b9   :  { %2158 = vmatmul.msk.f32.gmra.mxu0 %vm53_vm0, %v1453_v22 }
 0x3c2   :  { %v1492_v41 = vpop.f32.mrf.mxu3 }
 0x3c3   :  { %2159 = vmatmul.msk.f32.gmra.mxu0 %vm53_vm0, %v1492_v41 }
 0x3c4   :  { %v1531_v12 = vpop.f32.mrf.mxu1 }
 0x3cb   :  { %2160 = vmatmul.msk.f32.gmra.mxu0 %vm53_vm0, %v1531_v12 }
 0x3ce   :  { %v1570_v0 = vpop.f32.mrf.mxu3  ;;  %v1609_v43 = vpop.f32.mrf.mxu1 }
 0x3d3   :  { %2161 = vmatmul.msk.f32.gmra.mxu0 %vm53_vm0, %v1570_v0 }
 0x3d8   :  { %v1648_v53 = vpop.f32.mrf.mxu3 }
 0x3db   :  { %2162 = vmatmul.msk.f32.gmra.mxu0 %vm53_vm0, %v1609_v43 }
 0x3de   :  { %v1726_v34 = vpop.f32.mrf.mxu1 }
 0x3e0   :  { %v1687_v8 = vpop.f32.mrf.mxu3 }
 0x3e3   :  { %2163 = vmatmul.msk.f32.gmra.mxu0 %vm53_vm0, %v1648_v53 }
 0x3e8   :  { %v1765_v56 = vpop.f32.mrf.mxu3  ;;  %v1804_v49 = vpop.f32.mrf.mxu0 }
 0x3eb   :  { %2164 = vmatmul.msk.f32.gmra.mxu0 %vm53_vm0, %v1687_v8 }
 0x3ee   :  { %v1843_v5 = vpop.f32.mrf.mxu1 }
 0x3f3   :  { %2165 = vmatmul.msk.f32.gmra.mxu0 %vm53_vm0, %v1726_v34 }
 0x3f8   :  { %v1882_v4 = vpop.f32.mrf.mxu3 }
 0x3fb   :  { %2166 = vmatmul.msk.f32.gmra.mxu0 %vm53_vm0, %v1765_v56 }
 0x403   :  { %2167 = vmatmul.msk.f32.gmra.mxu0 %vm53_vm0, %v1804_v49 }
 0x40b   :  { %2168 = vmatmul.msk.f32.gmra.mxu0 %vm53_vm0, %v1843_v5 }
 0x40c   :  { %v1958_v40 = vpop.f32.mrf.mxu0 }
 0x40d   :  { %v1959_v51 = vadd.f32 %v2342_v1, %v1958_v40 }
 0x40f   :  { %2006 = vst.msk [vmem:[%s3575_s8] sm:$0xff] %vm53_vm0, %v1959_v51 }
 0x413   :  { %2169 = vmatmul.msk.f32.gmra.mxu0 %vm53_vm0, %v1882_v4 }
 0x41c   :  { %v1961_v48 = vpop.f32.mrf.mxu0 }
 0x41d   :  { %v1962_v62 = vadd.f32 %v2342_v1, %v1961_v48 }
 0x41f   :  { %2007 = vst.msk [vmem:[%s3575_s8 + $0x8] sm:$0xff] %vm53_vm0, %v1962_v62 }
 0x424   :  { %v1964_v17 = vpop.f32.mrf.mxu0 }
 0x425   :  { %v1965_v6 = vadd.f32 %v2342_v1, %v1964_v17 }
 0x427   :  { %2008 = vst.msk [vmem:[%s3575_s8 + $0x10] sm:$0xff] %vm53_vm0, %v1965_v6 }
 0x42c   :  { %v1967_v61 = vpop.f32.mrf.mxu0 }
 0x42d   :  { %v1968_v2 = vadd.f32 %v2342_v1, %v1967_v61 }
 0x42f   :  { %2009 = vst.msk [vmem:[%s3575_s8 + $0x18] sm:$0xff] %vm53_vm0, %v1968_v2 }
 0x436   :  { %v1970_v16 = vpop.f32.mrf.mxu0 }
 0x437   :  { %v1971_v35 = vadd.f32 %v2342_v1, %v1970_v16 }
 0x439   :  { %2010 = vst.msk [vmem:[%s3575_s8 + $0x20] sm:$0xff] %vm53_vm0, %v1971_v35 }
 0x440   :  { %v1973_v38 = vpop.f32.mrf.mxu0 }
 0x441   :  { %v1974_v23 = vadd.f32 %v2342_v1, %v1973_v38 }
 0x443   :  { %2011 = vst.msk [vmem:[%s3575_s8 + $0x28] sm:$0xff] %vm53_vm0, %v1974_v23 }
 0x448   :  { %v1976_v29 = vpop.f32.mrf.mxu0 }
 0x449   :  { %v1977_v57 = vadd.f32 %v2342_v1, %v1976_v29 }
 0x44b   :  { %2012 = vst.msk [vmem:[%s3575_s8 + $0x30] sm:$0xff] %vm53_vm0, %v1977_v57 }
 0x450   :  { %v1979_v13 = vpop.f32.mrf.mxu0 }
 0x451   :  { %v1980_v26 = vadd.f32 %v2342_v1, %v1979_v13 }
 0x453   :  { %2013 = vst.msk [vmem:[%s3575_s8 + $0x38] sm:$0xff] %vm53_vm0, %v1980_v26 }
 0x458   :  { %v1982_v31 = vpop.f32.mrf.mxu0 }
 0x459   :  { %v1983_v28 = vadd.f32 %v2342_v1, %v1982_v31 }
 0x45b   :  { %2014 = vst.msk [vmem:[%s3575_s8 + $0x40] sm:$0xff] %vm53_vm0, %v1983_v28 }
 0x460   :  { %v1985_v45 = vpop.f32.mrf.mxu0 }
 0x461   :  { %v1986_v18 = vadd.f32 %v2342_v1, %v1985_v45 }
 0x463   :  { %2015 = vst.msk [vmem:[%s3575_s8 + $0x48] sm:$0xff] %vm53_vm0, %v1986_v18 }
 0x468   :  { %v1988_v37 = vpop.f32.mrf.mxu0 }
 0x469   :  { %v1989_v20 = vadd.f32 %v2342_v1, %v1988_v37 }
 0x46b   :  { %2016 = vst.msk [vmem:[%s3575_s8 + $0x50] sm:$0xff] %vm53_vm0, %v1989_v20 }
 0x470   :  { %v1991_v15 = vpop.f32.mrf.mxu0 }
 0x471   :  { %v1992_v58 = vadd.f32 %v2342_v1, %v1991_v15 }
 0x473   :  { %2017 = vst.msk [vmem:[%s3575_s8 + $0x58] sm:$0xff] %vm53_vm0, %v1992_v58 }
 0x478   :  { %v1994_v10 = vpop.f32.mrf.mxu0 }
 0x479   :  { %v1995_v33 = vadd.f32 %v2342_v1, %v1994_v10 }
 0x47b   :  { %2018 = vst.msk [vmem:[%s3575_s8 + $0x60] sm:$0xff] %vm53_vm0, %v1995_v33 }
 0x480   :  { %v1997_v24 = vpop.f32.mrf.mxu0 }
 0x481   :  { %v1998_v7 = vadd.f32 %v2342_v1, %v1997_v24 }
 0x483   :  { %2019 = vst.msk [vmem:[%s3575_s8 + $0x68] sm:$0xff] %vm53_vm0, %v1998_v7 }
 0x488   :  { %v2000_v46 = vpop.f32.mrf.mxu0 }
 0x489   :  { %v2001_v3 = vadd.f32 %v2342_v1, %v2000_v46 }
 0x48b   :  { %2020 = vst.msk [vmem:[%s3575_s8 + $0x70] sm:$0xff] %vm53_vm0, %v2001_v3 }
 0x490   :  { %v2003_v30 = vpop.f32.mrf.mxu0 }
 0x491   :  { %v2004_v63 = vadd.f32 %v2342_v1, %v2003_v30 }
 0x493   :  { %2021 = vst.msk [vmem:[%s3575_s8 + $0x78] sm:$0xff] %vm53_vm0, %v2004_v63 }

</bundles_post_ra>
